<compile_context>
chip_gen: v5e
topology: v5e:2x2
jax: 0.10.0
libtpu: 0.0.40
codegen_flags: <defaults>
</compile_context>

<pallas_src>
import math
from functools import partial

import jax
import jax.numpy as jnp
from jax.experimental import pallas as pl
from jax.experimental.pallas import tpu as pltpu


# ---------------------------------------------------------------------------
# in-kernel helpers (traced inside the pallas kernel)
# ---------------------------------------------------------------------------
def _layernorm(x, w, b, eps=1e-5):
    # torch.nn.LayerNorm over the last dim (biased variance, eps=1e-5), f32 math
    mu = jnp.mean(x, axis=-1, keepdims=True)
    xc = x - mu
    var = jnp.mean(xc * xc, axis=-1, keepdims=True)
    return xc * jax.lax.rsqrt(var + eps) * w + b


def _dot(x_f32, w_bf16):
    # bf16 MXU inputs, f32 accumulation
    return jnp.dot(x_f32.astype(jnp.bfloat16), w_bf16,
                   preferred_element_type=jnp.float32)


# ---------------------------------------------------------------------------
# fused forward kernel: embed + N encoder layers + attention + classifier
# ---------------------------------------------------------------------------
def fused_forward_kernel(*refs, num_layers, embed_scale):
    x_ref = refs[0]
    o_ref = refs[-1]
    w = refs[1:-1]

    # --- embedding: src * sqrt(d_model) + PositionalEncoding row 0 ----------
    pe = w[0][...]
    x = x_ref[...] * embed_scale + pe                       # (B, D) f32

    # --- transformer encoder layers (post-norm, ReLU, eval dropout) ---------
    idx = 1
    for _ in range(num_layers):
        (w_attn, b_attn, ln1w, ln1b,
         w1, b1, w2, b2, ln2w, ln2b) = w[idx:idx + 10]
        idx += 10
        # self-attention with seq_len==1: softmax over one key == 1 => ctx == V;
        # V and output projections pre-folded into a single (D, D) matmul.
        attn = _dot(x, w_attn[...]) + b_attn[...]
        h = _layernorm(x + attn, ln1w[...], ln1b[...])
        # feed-forward
        f = jnp.maximum(_dot(h, w1[...]) + b1[...], 0.0)
        f = _dot(f, w2[...]) + b2[...]
        x = _layernorm(h + f, ln2w[...], ln2b[...])

    # --- final self.attention(...) -> Linear -> ReLU -> Linear --------------
    wA, bA, cw1, cb1, cw2p, cb2p = w[idx:idx + 6]
    a = _dot(x, wA[...]) + bA[...]
    h = jnp.maximum(_dot(a, cw1[...]) + cb1[...], 0.0)
    # lane-dense (B, 128)-padded logits; sliced to num_classes in the wrapper
    o_ref[...] = _dot(h, cw2p[...]) + cb2p[...]


# ---------------------------------------------------------------------------
# wrapper: single pallas_call, batch grid, weights VMEM-resident
# ---------------------------------------------------------------------------
def transformer_classification_forward(src, params):
    """fast_transformer=True forward path. src: (batch, feature) f32."""
    B, D = src.shape
    num_layers = len(params["layers"])

    flat_w = [params["pe"]]
    for lp in params["layers"]:
        flat_w += [lp[k] for k in ("w_attn", "b_attn", "ln1w", "ln1b",
                                   "w1", "b1", "w2", "b2", "ln2w", "ln2b")]
    flat_w += [params["attn"]["w_attn"], params["attn"]["b_attn"],
               params["cls"]["w1"], params["cls"]["b1"],
               params["cls"]["w2p"], params["cls"]["b2p"]]

    lane_pad = flat_w[-1].shape[-1]                 # 128-padded num_classes

    # Batch tile: full batch for small B; cap at 512 rows so activations +
    # ffn intermediates double-buffer comfortably even on v7x's 64 MiB VMEM.
    bb = B if B <= 512 else 512
    assert B % bb == 0, "batch must be a multiple of the batch tile"
    grid = (B // bb,)

    x_spec = pl.BlockSpec((bb, D), lambda i: (i, 0))
    w_specs = [pl.BlockSpec(wt.shape, lambda i: (0, 0)) for wt in flat_w]
    out_spec = pl.BlockSpec((bb, lane_pad), lambda i: (i, 0))

    out_padded = pl.pallas_call(
        partial(fused_forward_kernel, num_layers=num_layers,
                embed_scale=math.sqrt(D)),
        out_shape=jax.ShapeDtypeStruct((B, lane_pad), jnp.float32),
        grid=grid,
        in_specs=[x_spec] + w_specs,
        out_specs=out_spec,
        compiler_params=pltpu.CompilerParams(
            dimension_semantics=("parallel",),        # shards batch across TCs on v7x
            vmem_limit_bytes=32 * 1024 * 1024),
    )(src, *flat_w)

    logits = out_padded[:, :params["num_classes"]]
    # TODO(synk): return_embeddings / return_attention extras not wired through
    # (attention weights over a length-1 sequence are identically 1).
    return {"class_output": logits}


# ---------------------------------------------------------------------------
# deterministic parameter construction (synthetic, no checkpoint)
# ---------------------------------------------------------------------------
def init_params(key, d_model, nhead, dim_feedforward, hidden_layer_size,
                num_classes, num_layers):
    def dense(k, din, dout, s=0.02):
        kw, kb = jax.random.split(k)
        return (s * jax.random.normal(kw, (din, dout), jnp.float32),
                s * jax.random.normal(kb, (1, dout), jnp.float32))

    def folded_attention(k):
        # Q/K projections are provably dead with seq_len==1 (softmax over a
        # single key == 1, so ctx == V); fold V and output projections offline.
        ks = jax.random.split(k, 4)
        _wq, _bq = dense(ks[0], d_model, d_model)   # dead
        _wk, _bk = dense(ks[1], d_model, d_model)   # dead
        wv, bv = dense(ks[2], d_model, d_model)
        wo, bo = dense(ks[3], d_model, d_model)
        w_attn = (wv @ wo).astype(jnp.bfloat16)
        b_attn = (bv @ wo + bo).astype(jnp.float32)
        return w_attn, b_attn

    keys = jax.random.split(key, num_layers + 2)
    layers = []
    for i in range(num_layers):
        ks = jax.random.split(keys[i], 3)
        w_attn, b_attn = folded_attention(ks[0])
        w1, b1 = dense(ks[1], d_model, dim_feedforward)
        w2, b2 = dense(ks[2], dim_feedforward, d_model)
        layers.append(dict(
            w_attn=w_attn, b_attn=b_attn,
            ln1w=jnp.ones((1, d_model), jnp.float32),
            ln1b=jnp.zeros((1, d_model), jnp.float32),
            w1=w1.astype(jnp.bfloat16), b1=b1,
            w2=w2.astype(jnp.bfloat16), b2=b2,
            ln2w=jnp.ones((1, d_model), jnp.float32),
            ln2b=jnp.zeros((1, d_model), jnp.float32)))

    aw, ab = folded_attention(keys[num_layers])
    attn = dict(w_attn=aw, b_attn=ab)

    kc = jax.random.split(keys[num_layers + 1], 2)
    cw1, cb1 = dense(kc[0], d_model, hidden_layer_size)
    cw2, cb2 = dense(kc[1], hidden_layer_size, num_classes)
    # lane-dense padded classifier head (write 128-wide, slice in wrapper)
    lane_pad = max(128, ((num_classes + 127) // 128) * 128)
    cw2p = jnp.zeros((hidden_layer_size, lane_pad), jnp.float32)
    cw2p = cw2p.at[:, :num_classes].set(cw2)
    cb2p = jnp.zeros((1, lane_pad), jnp.float32).at[:, :num_classes].set(cb2[0])
    cls = dict(w1=cw1.astype(jnp.bfloat16), b1=cb1,
               w2p=cw2p.astype(jnp.bfloat16), b2p=cb2p)

    # PositionalEncoding row for position 0 (the only position used: seq_len==1)
    div = jnp.exp(jnp.arange(0, d_model, 2, dtype=jnp.float32)
                  * (-math.log(10000.0) / d_model))
    pe = jnp.zeros((1, d_model), jnp.float32)
    pe = pe.at[0, 0::2].set(jnp.sin(0.0 * div))
    pe = pe.at[0, 1::2].set(jnp.cos(0.0 * div))

    return dict(pe=pe, layers=layers, attn=attn, cls=cls,
                nhead=nhead, num_classes=num_classes)


if __name__ == "__main__":
    # small, TPU-friendly config consistent with the module's constructor
    batch = 8
    feature_size = 128          # d_model
    nhead = 8
    num_transformer_layers = 2
    dim_feedforward = 256
    hidden_layer_size = 256
    num_classes = 8

    key = jax.random.PRNGKey(0)
    kp, kx = jax.random.split(key)
    params = init_params(kp, feature_size, nhead, dim_feedforward,
                         hidden_layer_size, num_classes, num_transformer_layers)
    src = jax.random.normal(kx, (batch, feature_size), jnp.float32)

    out = transformer_classification_forward(src, params)
    logits = jax.block_until_ready(out["class_output"])
    assert logits.shape == (batch, num_classes)
    assert bool(jnp.all(jnp.isfinite(logits)))
    print("KERNEL_OK")
</pallas_src>

<mosaic_0001>
module attributes {stable_mosaic.version = 11 : i64} {
  func.func @fused_forward_kernel(%arg0: i32, %arg1: memref<8x128xf32, #tpu.memory_space<vmem>>, %arg2: memref<1x128xf32, #tpu.memory_space<vmem>>, %arg3: memref<128x128xbf16, #tpu.memory_space<vmem>>, %arg4: memref<1x128xf32, #tpu.memory_space<vmem>>, %arg5: memref<1x128xf32, #tpu.memory_space<vmem>>, %arg6: memref<1x128xf32, #tpu.memory_space<vmem>>, %arg7: memref<128x256xbf16, #tpu.memory_space<vmem>>, %arg8: memref<1x256xf32, #tpu.memory_space<vmem>>, %arg9: memref<256x128xbf16, #tpu.memory_space<vmem>>, %arg10: memref<1x128xf32, #tpu.memory_space<vmem>>, %arg11: memref<1x128xf32, #tpu.memory_space<vmem>>, %arg12: memref<1x128xf32, #tpu.memory_space<vmem>>, %arg13: memref<128x128xbf16, #tpu.memory_space<vmem>>, %arg14: memref<1x128xf32, #tpu.memory_space<vmem>>, %arg15: memref<1x128xf32, #tpu.memory_space<vmem>>, %arg16: memref<1x128xf32, #tpu.memory_space<vmem>>, %arg17: memref<128x256xbf16, #tpu.memory_space<vmem>>, %arg18: memref<1x256xf32, #tpu.memory_space<vmem>>, %arg19: memref<256x128xbf16, #tpu.memory_space<vmem>>, %arg20: memref<1x128xf32, #tpu.memory_space<vmem>>, %arg21: memref<1x128xf32, #tpu.memory_space<vmem>>, %arg22: memref<1x128xf32, #tpu.memory_space<vmem>>, %arg23: memref<128x128xbf16, #tpu.memory_space<vmem>>, %arg24: memref<1x128xf32, #tpu.memory_space<vmem>>, %arg25: memref<128x256xbf16, #tpu.memory_space<vmem>>, %arg26: memref<1x256xf32, #tpu.memory_space<vmem>>, %arg27: memref<256x128xbf16, #tpu.memory_space<vmem>>, %arg28: memref<1x128xf32, #tpu.memory_space<vmem>>, %arg29: memref<8x128xf32, #tpu.memory_space<vmem>>) attributes {dimension_semantics = [#tpu.dimension_semantics<parallel>], iteration_bounds = array<i64: 1>, scalar_prefetch = 0 : i64, scratch_operands = 0 : i64, tpu.core_type = #tpu.core_type<tc>, window_params = [{transform_indices = @transform_0, window_bounds = array<i64: 8, 128>}, {pipeline_mode = #tpu.pipeline_mode<synchronous>, transform_indices = @transform_1, window_bounds = array<i64: 1, 128>}, {pipeline_mode = #tpu.pipeline_mode<synchronous>, transform_indices = @transform_2, window_bounds = array<i64: 128, 128>}, {pipeline_mode = #tpu.pipeline_mode<synchronous>, transform_indices = @transform_3, window_bounds = array<i64: 1, 128>}, {pipeline_mode = #tpu.pipeline_mode<synchronous>, transform_indices = @transform_4, window_bounds = array<i64: 1, 128>}, {pipeline_mode = #tpu.pipeline_mode<synchronous>, transform_indices = @transform_5, window_bounds = array<i64: 1, 128>}, {pipeline_mode = #tpu.pipeline_mode<synchronous>, transform_indices = @transform_6, window_bounds = array<i64: 128, 256>}, {pipeline_mode = #tpu.pipeline_mode<synchronous>, transform_indices = @transform_7, window_bounds = array<i64: 1, 256>}, {pipeline_mode = #tpu.pipeline_mode<synchronous>, transform_indices = @transform_8, window_bounds = array<i64: 256, 128>}, {pipeline_mode = #tpu.pipeline_mode<synchronous>, transform_indices = @transform_9, window_bounds = array<i64: 1, 128>}, {pipeline_mode = #tpu.pipeline_mode<synchronous>, transform_indices = @transform_10, window_bounds = array<i64: 1, 128>}, {pipeline_mode = #tpu.pipeline_mode<synchronous>, transform_indices = @transform_11, window_bounds = array<i64: 1, 128>}, {pipeline_mode = #tpu.pipeline_mode<synchronous>, transform_indices = @transform_12, window_bounds = array<i64: 128, 128>}, {pipeline_mode = #tpu.pipeline_mode<synchronous>, transform_indices = @transform_13, window_bounds = array<i64: 1, 128>}, {pipeline_mode = #tpu.pipeline_mode<synchronous>, transform_indices = @transform_14, window_bounds = array<i64: 1, 128>}, {pipeline_mode = #tpu.pipeline_mode<synchronous>, transform_indices = @transform_15, window_bounds = array<i64: 1, 128>}, {pipeline_mode = #tpu.pipeline_mode<synchronous>, transform_indices = @transform_16, window_bounds = array<i64: 128, 256>}, {pipeline_mode = #tpu.pipeline_mode<synchronous>, transform_indices = @transform_17, window_bounds = array<i64: 1, 256>}, {pipeline_mode = #tpu.pipeline_mode<synchronous>, transform_indices = @transform_18, window_bounds = array<i64: 256, 128>}, {pipeline_mode = #tpu.pipeline_mode<synchronous>, transform_indices = @transform_19, window_bounds = array<i64: 1, 128>}, {pipeline_mode = #tpu.pipeline_mode<synchronous>, transform_indices = @transform_20, window_bounds = array<i64: 1, 128>}, {pipeline_mode = #tpu.pipeline_mode<synchronous>, transform_indices = @transform_21, window_bounds = array<i64: 1, 128>}, {pipeline_mode = #tpu.pipeline_mode<synchronous>, transform_indices = @transform_22, window_bounds = array<i64: 128, 128>}, {pipeline_mode = #tpu.pipeline_mode<synchronous>, transform_indices = @transform_23, window_bounds = array<i64: 1, 128>}, {pipeline_mode = #tpu.pipeline_mode<synchronous>, transform_indices = @transform_24, window_bounds = array<i64: 128, 256>}, {pipeline_mode = #tpu.pipeline_mode<synchronous>, transform_indices = @transform_25, window_bounds = array<i64: 1, 256>}, {pipeline_mode = #tpu.pipeline_mode<synchronous>, transform_indices = @transform_26, window_bounds = array<i64: 256, 128>}, {pipeline_mode = #tpu.pipeline_mode<synchronous>, transform_indices = @transform_27, window_bounds = array<i64: 1, 128>}, {transform_indices = @transform_28, window_bounds = array<i64: 8, 128>}]} {
    %c0 = arith.constant 0 : index
    %c0_0 = arith.constant 0 : index
    %0 = vector.load %arg2[%c0, %c0_0] : memref<1x128xf32, #tpu.memory_space<vmem>>, vector<1x128xf32>
    %c0_1 = arith.constant 0 : index
    %c0_2 = arith.constant 0 : index
    %1 = vector.load %arg1[%c0_1, %c0_2] : memref<8x128xf32, #tpu.memory_space<vmem>>, vector<8x128xf32>
    %cst = arith.constant 11.3137083 : f32
    %2 = vector.broadcast %cst : f32 to vector<8x128xf32>
    %3 = arith.mulf %1, %2 : vector<8x128xf32>
    %4 = vector.broadcast %0 : vector<1x128xf32> to vector<8x128xf32>
    %5 = arith.addf %3, %4 : vector<8x128xf32>
    %c0_3 = arith.constant 0 : index
    %c0_4 = arith.constant 0 : index
    %6 = vector.load %arg3[%c0_3, %c0_4] : memref<128x128xbf16, #tpu.memory_space<vmem>>, vector<128x128xbf16>
    %7 = arith.truncf %5 : vector<8x128xf32> to vector<8x128xbf16>
    %cst_5 = arith.constant dense<0.000000e+00> : vector<8x128xf32>
    %8 = tpu.matmul %7, %6, %cst_5 {dimension_numbers = #tpu.dot_dimension_numbers<[1], [0], [0], [1], [0, 0, 1, 1], [], []>} : vector<8x128xbf16>, vector<128x128xbf16>, vector<8x128xf32> -> vector<8x128xf32>
    %c0_6 = arith.constant 0 : index
    %c0_7 = arith.constant 0 : index
    %9 = vector.load %arg4[%c0_6, %c0_7] : memref<1x128xf32, #tpu.memory_space<vmem>>, vector<1x128xf32>
    %10 = vector.broadcast %9 : vector<1x128xf32> to vector<8x128xf32>
    %11 = arith.addf %8, %10 : vector<8x128xf32>
    %12 = arith.addf %5, %11 : vector<8x128xf32>
    %c0_8 = arith.constant 0 : index
    %c0_9 = arith.constant 0 : index
    %13 = vector.load %arg5[%c0_8, %c0_9] : memref<1x128xf32, #tpu.memory_space<vmem>>, vector<1x128xf32>
    %c0_10 = arith.constant 0 : index
    %c0_11 = arith.constant 0 : index
    %14 = vector.load %arg6[%c0_10, %c0_11] : memref<1x128xf32, #tpu.memory_space<vmem>>, vector<1x128xf32>
    %cst_12 = arith.constant dense<0.000000e+00> : vector<8xf32>
    %15 = vector.multi_reduction <add>, %12, %cst_12 [1] : vector<8x128xf32> to vector<8xf32>
    %16 = vector.shape_cast %15 : vector<8xf32> to vector<8x1xf32>
    %cst_13 = arith.constant 1.280000e+02 : f32
    %17 = vector.broadcast %cst_13 : f32 to vector<8x1xf32>
    %18 = arith.divf %16, %17 : vector<8x1xf32>
    %19 = vector.broadcast %18 : vector<8x1xf32> to vector<8x128xf32>
    %20 = arith.subf %12, %19 : vector<8x128xf32>
    %21 = arith.mulf %20, %20 : vector<8x128xf32>
    %cst_14 = arith.constant dense<0.000000e+00> : vector<8xf32>
    %22 = vector.multi_reduction <add>, %21, %cst_14 [1] : vector<8x128xf32> to vector<8xf32>
    %23 = vector.shape_cast %22 : vector<8xf32> to vector<8x1xf32>
    %cst_15 = arith.constant 1.280000e+02 : f32
    %24 = vector.broadcast %cst_15 : f32 to vector<8x1xf32>
    %25 = arith.divf %23, %24 : vector<8x1xf32>
    %cst_16 = arith.constant 9.99999974E-6 : f32
    %26 = vector.broadcast %cst_16 : f32 to vector<8x1xf32>
    %27 = arith.addf %25, %26 : vector<8x1xf32>
    %28 = math.rsqrt %27 : vector<8x1xf32>
    %29 = vector.broadcast %28 : vector<8x1xf32> to vector<8x128xf32>
    %30 = arith.mulf %20, %29 : vector<8x128xf32>
    %31 = vector.broadcast %13 : vector<1x128xf32> to vector<8x128xf32>
    %32 = arith.mulf %30, %31 : vector<8x128xf32>
    %33 = vector.broadcast %14 : vector<1x128xf32> to vector<8x128xf32>
    %34 = arith.addf %32, %33 : vector<8x128xf32>
    %c0_17 = arith.constant 0 : index
    %c0_18 = arith.constant 0 : index
    %35 = vector.load %arg7[%c0_17, %c0_18] : memref<128x256xbf16, #tpu.memory_space<vmem>>, vector<128x256xbf16>
    %36 = arith.truncf %34 : vector<8x128xf32> to vector<8x128xbf16>
    %cst_19 = arith.constant dense<0.000000e+00> : vector<8x256xf32>
    %37 = tpu.matmul %36, %35, %cst_19 {dimension_numbers = #tpu.dot_dimension_numbers<[1], [0], [0], [1], [0, 0, 1, 1], [], []>} : vector<8x128xbf16>, vector<128x256xbf16>, vector<8x256xf32> -> vector<8x256xf32>
    %c0_20 = arith.constant 0 : index
    %c0_21 = arith.constant 0 : index
    %38 = vector.load %arg8[%c0_20, %c0_21] : memref<1x256xf32, #tpu.memory_space<vmem>>, vector<1x256xf32>
    %39 = vector.broadcast %38 : vector<1x256xf32> to vector<8x256xf32>
    %40 = arith.addf %37, %39 : vector<8x256xf32>
    %cst_22 = arith.constant 0.000000e+00 : f32
    %41 = vector.broadcast %cst_22 : f32 to vector<8x256xf32>
    %42 = arith.maximumf %40, %41 : vector<8x256xf32>
    %c0_23 = arith.constant 0 : index
    %c0_24 = arith.constant 0 : index
    %43 = vector.load %arg9[%c0_23, %c0_24] : memref<256x128xbf16, #tpu.memory_space<vmem>>, vector<256x128xbf16>
    %44 = arith.truncf %42 : vector<8x256xf32> to vector<8x256xbf16>
    %cst_25 = arith.constant dense<0.000000e+00> : vector<8x128xf32>
    %45 = tpu.matmul %44, %43, %cst_25 {dimension_numbers = #tpu.dot_dimension_numbers<[1], [0], [0], [1], [0, 0, 1, 1], [], []>} : vector<8x256xbf16>, vector<256x128xbf16>, vector<8x128xf32> -> vector<8x128xf32>
    %c0_26 = arith.constant 0 : index
    %c0_27 = arith.constant 0 : index
    %46 = vector.load %arg10[%c0_26, %c0_27] : memref<1x128xf32, #tpu.memory_space<vmem>>, vector<1x128xf32>
    %47 = vector.broadcast %46 : vector<1x128xf32> to vector<8x128xf32>
    %48 = arith.addf %45, %47 : vector<8x128xf32>
    %49 = arith.addf %34, %48 : vector<8x128xf32>
    %c0_28 = arith.constant 0 : index
    %c0_29 = arith.constant 0 : index
    %50 = vector.load %arg11[%c0_28, %c0_29] : memref<1x128xf32, #tpu.memory_space<vmem>>, vector<1x128xf32>
    %c0_30 = arith.constant 0 : index
    %c0_31 = arith.constant 0 : index
    %51 = vector.load %arg12[%c0_30, %c0_31] : memref<1x128xf32, #tpu.memory_space<vmem>>, vector<1x128xf32>
    %cst_32 = arith.constant dense<0.000000e+00> : vector<8xf32>
    %52 = vector.multi_reduction <add>, %49, %cst_32 [1] : vector<8x128xf32> to vector<8xf32>
    %53 = vector.shape_cast %52 : vector<8xf32> to vector<8x1xf32>
    %cst_33 = arith.constant 1.280000e+02 : f32
    %54 = vector.broadcast %cst_33 : f32 to vector<8x1xf32>
    %55 = arith.divf %53, %54 : vector<8x1xf32>
    %56 = vector.broadcast %55 : vector<8x1xf32> to vector<8x128xf32>
    %57 = arith.subf %49, %56 : vector<8x128xf32>
    %58 = arith.mulf %57, %57 : vector<8x128xf32>
    %cst_34 = arith.constant dense<0.000000e+00> : vector<8xf32>
    %59 = vector.multi_reduction <add>, %58, %cst_34 [1] : vector<8x128xf32> to vector<8xf32>
    %60 = vector.shape_cast %59 : vector<8xf32> to vector<8x1xf32>
    %cst_35 = arith.constant 1.280000e+02 : f32
    %61 = vector.broadcast %cst_35 : f32 to vector<8x1xf32>
    %62 = arith.divf %60, %61 : vector<8x1xf32>
    %cst_36 = arith.constant 9.99999974E-6 : f32
    %63 = vector.broadcast %cst_36 : f32 to vector<8x1xf32>
    %64 = arith.addf %62, %63 : vector<8x1xf32>
    %65 = math.rsqrt %64 : vector<8x1xf32>
    %66 = vector.broadcast %65 : vector<8x1xf32> to vector<8x128xf32>
    %67 = arith.mulf %57, %66 : vector<8x128xf32>
    %68 = vector.broadcast %50 : vector<1x128xf32> to vector<8x128xf32>
    %69 = arith.mulf %67, %68 : vector<8x128xf32>
    %70 = vector.broadcast %51 : vector<1x128xf32> to vector<8x128xf32>
    %71 = arith.addf %69, %70 : vector<8x128xf32>
    %c0_37 = arith.constant 0 : index
    %c0_38 = arith.constant 0 : index
    %72 = vector.load %arg13[%c0_37, %c0_38] : memref<128x128xbf16, #tpu.memory_space<vmem>>, vector<128x128xbf16>
    %73 = arith.truncf %71 : vector<8x128xf32> to vector<8x128xbf16>
    %cst_39 = arith.constant dense<0.000000e+00> : vector<8x128xf32>
    %74 = tpu.matmul %73, %72, %cst_39 {dimension_numbers = #tpu.dot_dimension_numbers<[1], [0], [0], [1], [0, 0, 1, 1], [], []>} : vector<8x128xbf16>, vector<128x128xbf16>, vector<8x128xf32> -> vector<8x128xf32>
    %c0_40 = arith.constant 0 : index
    %c0_41 = arith.constant 0 : index
    %75 = vector.load %arg14[%c0_40, %c0_41] : memref<1x128xf32, #tpu.memory_space<vmem>>, vector<1x128xf32>
    %76 = vector.broadcast %75 : vector<1x128xf32> to vector<8x128xf32>
    %77 = arith.addf %74, %76 : vector<8x128xf32>
    %78 = arith.addf %71, %77 : vector<8x128xf32>
    %c0_42 = arith.constant 0 : index
    %c0_43 = arith.constant 0 : index
    %79 = vector.load %arg15[%c0_42, %c0_43] : memref<1x128xf32, #tpu.memory_space<vmem>>, vector<1x128xf32>
    %c0_44 = arith.constant 0 : index
    %c0_45 = arith.constant 0 : index
    %80 = vector.load %arg16[%c0_44, %c0_45] : memref<1x128xf32, #tpu.memory_space<vmem>>, vector<1x128xf32>
    %cst_46 = arith.constant dense<0.000000e+00> : vector<8xf32>
    %81 = vector.multi_reduction <add>, %78, %cst_46 [1] : vector<8x128xf32> to vector<8xf32>
    %82 = vector.shape_cast %81 : vector<8xf32> to vector<8x1xf32>
    %cst_47 = arith.constant 1.280000e+02 : f32
    %83 = vector.broadcast %cst_47 : f32 to vector<8x1xf32>
    %84 = arith.divf %82, %83 : vector<8x1xf32>
    %85 = vector.broadcast %84 : vector<8x1xf32> to vector<8x128xf32>
    %86 = arith.subf %78, %85 : vector<8x128xf32>
    %87 = arith.mulf %86, %86 : vector<8x128xf32>
    %cst_48 = arith.constant dense<0.000000e+00> : vector<8xf32>
    %88 = vector.multi_reduction <add>, %87, %cst_48 [1] : vector<8x128xf32> to vector<8xf32>
    %89 = vector.shape_cast %88 : vector<8xf32> to vector<8x1xf32>
    %cst_49 = arith.constant 1.280000e+02 : f32
    %90 = vector.broadcast %cst_49 : f32 to vector<8x1xf32>
    %91 = arith.divf %89, %90 : vector<8x1xf32>
    %cst_50 = arith.constant 9.99999974E-6 : f32
    %92 = vector.broadcast %cst_50 : f32 to vector<8x1xf32>
    %93 = arith.addf %91, %92 : vector<8x1xf32>
    %94 = math.rsqrt %93 : vector<8x1xf32>
    %95 = vector.broadcast %94 : vector<8x1xf32> to vector<8x128xf32>
    %96 = arith.mulf %86, %95 : vector<8x128xf32>
    %97 = vector.broadcast %79 : vector<1x128xf32> to vector<8x128xf32>
    %98 = arith.mulf %96, %97 : vector<8x128xf32>
    %99 = vector.broadcast %80 : vector<1x128xf32> to vector<8x128xf32>
    %100 = arith.addf %98, %99 : vector<8x128xf32>
    %c0_51 = arith.constant 0 : index
    %c0_52 = arith.constant 0 : index
    %101 = vector.load %arg17[%c0_51, %c0_52] : memref<128x256xbf16, #tpu.memory_space<vmem>>, vector<128x256xbf16>
    %102 = arith.truncf %100 : vector<8x128xf32> to vector<8x128xbf16>
    %cst_53 = arith.constant dense<0.000000e+00> : vector<8x256xf32>
    %103 = tpu.matmul %102, %101, %cst_53 {dimension_numbers = #tpu.dot_dimension_numbers<[1], [0], [0], [1], [0, 0, 1, 1], [], []>} : vector<8x128xbf16>, vector<128x256xbf16>, vector<8x256xf32> -> vector<8x256xf32>
    %c0_54 = arith.constant 0 : index
    %c0_55 = arith.constant 0 : index
    %104 = vector.load %arg18[%c0_54, %c0_55] : memref<1x256xf32, #tpu.memory_space<vmem>>, vector<1x256xf32>
    %105 = vector.broadcast %104 : vector<1x256xf32> to vector<8x256xf32>
    %106 = arith.addf %103, %105 : vector<8x256xf32>
    %cst_56 = arith.constant 0.000000e+00 : f32
    %107 = vector.broadcast %cst_56 : f32 to vector<8x256xf32>
    %108 = arith.maximumf %106, %107 : vector<8x256xf32>
    %c0_57 = arith.constant 0 : index
    %c0_58 = arith.constant 0 : index
    %109 = vector.load %arg19[%c0_57, %c0_58] : memref<256x128xbf16, #tpu.memory_space<vmem>>, vector<256x128xbf16>
    %110 = arith.truncf %108 : vector<8x256xf32> to vector<8x256xbf16>
    %cst_59 = arith.constant dense<0.000000e+00> : vector<8x128xf32>
    %111 = tpu.matmul %110, %109, %cst_59 {dimension_numbers = #tpu.dot_dimension_numbers<[1], [0], [0], [1], [0, 0, 1, 1], [], []>} : vector<8x256xbf16>, vector<256x128xbf16>, vector<8x128xf32> -> vector<8x128xf32>
    %c0_60 = arith.constant 0 : index
    %c0_61 = arith.constant 0 : index
    %112 = vector.load %arg20[%c0_60, %c0_61] : memref<1x128xf32, #tpu.memory_space<vmem>>, vector<1x128xf32>
    %113 = vector.broadcast %112 : vector<1x128xf32> to vector<8x128xf32>
    %114 = arith.addf %111, %113 : vector<8x128xf32>
    %115 = arith.addf %100, %114 : vector<8x128xf32>
    %c0_62 = arith.constant 0 : index
    %c0_63 = arith.constant 0 : index
    %116 = vector.load %arg21[%c0_62, %c0_63] : memref<1x128xf32, #tpu.memory_space<vmem>>, vector<1x128xf32>
    %c0_64 = arith.constant 0 : index
    %c0_65 = arith.constant 0 : index
    %117 = vector.load %arg22[%c0_64, %c0_65] : memref<1x128xf32, #tpu.memory_space<vmem>>, vector<1x128xf32>
    %cst_66 = arith.constant dense<0.000000e+00> : vector<8xf32>
    %118 = vector.multi_reduction <add>, %115, %cst_66 [1] : vector<8x128xf32> to vector<8xf32>
    %119 = vector.shape_cast %118 : vector<8xf32> to vector<8x1xf32>
    %cst_67 = arith.constant 1.280000e+02 : f32
    %120 = vector.broadcast %cst_67 : f32 to vector<8x1xf32>
    %121 = arith.divf %119, %120 : vector<8x1xf32>
    %122 = vector.broadcast %121 : vector<8x1xf32> to vector<8x128xf32>
    %123 = arith.subf %115, %122 : vector<8x128xf32>
    %124 = arith.mulf %123, %123 : vector<8x128xf32>
    %cst_68 = arith.constant dense<0.000000e+00> : vector<8xf32>
    %125 = vector.multi_reduction <add>, %124, %cst_68 [1] : vector<8x128xf32> to vector<8xf32>
    %126 = vector.shape_cast %125 : vector<8xf32> to vector<8x1xf32>
    %cst_69 = arith.constant 1.280000e+02 : f32
    %127 = vector.broadcast %cst_69 : f32 to vector<8x1xf32>
    %128 = arith.divf %126, %127 : vector<8x1xf32>
    %cst_70 = arith.constant 9.99999974E-6 : f32
    %129 = vector.broadcast %cst_70 : f32 to vector<8x1xf32>
    %130 = arith.addf %128, %129 : vector<8x1xf32>
    %131 = math.rsqrt %130 : vector<8x1xf32>
    %132 = vector.broadcast %131 : vector<8x1xf32> to vector<8x128xf32>
    %133 = arith.mulf %123, %132 : vector<8x128xf32>
    %134 = vector.broadcast %116 : vector<1x128xf32> to vector<8x128xf32>
    %135 = arith.mulf %133, %134 : vector<8x128xf32>
    %136 = vector.broadcast %117 : vector<1x128xf32> to vector<8x128xf32>
    %137 = arith.addf %135, %136 : vector<8x128xf32>
    %c0_71 = arith.constant 0 : index
    %c0_72 = arith.constant 0 : index
    %138 = vector.load %arg23[%c0_71, %c0_72] : memref<128x128xbf16, #tpu.memory_space<vmem>>, vector<128x128xbf16>
    %139 = arith.truncf %137 : vector<8x128xf32> to vector<8x128xbf16>
    %cst_73 = arith.constant dense<0.000000e+00> : vector<8x128xf32>
    %140 = tpu.matmul %139, %138, %cst_73 {dimension_numbers = #tpu.dot_dimension_numbers<[1], [0], [0], [1], [0, 0, 1, 1], [], []>} : vector<8x128xbf16>, vector<128x128xbf16>, vector<8x128xf32> -> vector<8x128xf32>
    %c0_74 = arith.constant 0 : index
    %c0_75 = arith.constant 0 : index
    %141 = vector.load %arg24[%c0_74, %c0_75] : memref<1x128xf32, #tpu.memory_space<vmem>>, vector<1x128xf32>
    %142 = vector.broadcast %141 : vector<1x128xf32> to vector<8x128xf32>
    %143 = arith.addf %140, %142 : vector<8x128xf32>
    %c0_76 = arith.constant 0 : index
    %c0_77 = arith.constant 0 : index
    %144 = vector.load %arg25[%c0_76, %c0_77] : memref<128x256xbf16, #tpu.memory_space<vmem>>, vector<128x256xbf16>
    %145 = arith.truncf %143 : vector<8x128xf32> to vector<8x128xbf16>
    %cst_78 = arith.constant dense<0.000000e+00> : vector<8x256xf32>
    %146 = tpu.matmul %145, %144, %cst_78 {dimension_numbers = #tpu.dot_dimension_numbers<[1], [0], [0], [1], [0, 0, 1, 1], [], []>} : vector<8x128xbf16>, vector<128x256xbf16>, vector<8x256xf32> -> vector<8x256xf32>
    %c0_79 = arith.constant 0 : index
    %c0_80 = arith.constant 0 : index
    %147 = vector.load %arg26[%c0_79, %c0_80] : memref<1x256xf32, #tpu.memory_space<vmem>>, vector<1x256xf32>
    %148 = vector.broadcast %147 : vector<1x256xf32> to vector<8x256xf32>
    %149 = arith.addf %146, %148 : vector<8x256xf32>
    %cst_81 = arith.constant 0.000000e+00 : f32
    %150 = vector.broadcast %cst_81 : f32 to vector<8x256xf32>
    %151 = arith.maximumf %149, %150 : vector<8x256xf32>
    %c0_82 = arith.constant 0 : index
    %c0_83 = arith.constant 0 : index
    %152 = vector.load %arg27[%c0_82, %c0_83] : memref<256x128xbf16, #tpu.memory_space<vmem>>, vector<256x128xbf16>
    %153 = arith.truncf %151 : vector<8x256xf32> to vector<8x256xbf16>
    %cst_84 = arith.constant dense<0.000000e+00> : vector<8x128xf32>
    %154 = tpu.matmul %153, %152, %cst_84 {dimension_numbers = #tpu.dot_dimension_numbers<[1], [0], [0], [1], [0, 0, 1, 1], [], []>} : vector<8x256xbf16>, vector<256x128xbf16>, vector<8x128xf32> -> vector<8x128xf32>
    %c0_85 = arith.constant 0 : index
    %c0_86 = arith.constant 0 : index
    %155 = vector.load %arg28[%c0_85, %c0_86] : memref<1x128xf32, #tpu.memory_space<vmem>>, vector<1x128xf32>
    %156 = vector.broadcast %155 : vector<1x128xf32> to vector<8x128xf32>
    %157 = arith.addf %154, %156 : vector<8x128xf32>
    %c0_87 = arith.constant 0 : index
    %c0_88 = arith.constant 0 : index
    %158 = vector.load %arg29[%c0_87, %c0_88] : memref<8x128xf32, #tpu.memory_space<vmem>>, vector<8x128xf32>
    tpu.vector_store %arg29[%c0_87, %c0_88], %157 {strides = array<i32>} : memref<8x128xf32, #tpu.memory_space<vmem>>, vector<8x128xf32>,
    return
  }
  func.func @transform_0(%arg0: i32) -> (i32, i32) {
    %c0_i32 = arith.constant 0 : i32
    %c0_i32_0 = arith.constant 0 : i32
    return %arg0, %c0_i32 : i32, i32
  }
  func.func @transform_1(%arg0: i32) -> (i32, i32) {
    %c0_i32 = arith.constant 0 : i32
    %c0_i32_0 = arith.constant 0 : i32
    %c0_i32_1 = arith.constant 0 : i32
    return %c0_i32, %c0_i32_0 : i32, i32
  }
  func.func @transform_2(%arg0: i32) -> (i32, i32) {
    %c0_i32 = arith.constant 0 : i32
    %c0_i32_0 = arith.constant 0 : i32
    %c0_i32_1 = arith.constant 0 : i32
    return %c0_i32, %c0_i32_0 : i32, i32
  }
  func.func @transform_3(%arg0: i32) -> (i32, i32) {
    %c0_i32 = arith.constant 0 : i32
    %c0_i32_0 = arith.constant 0 : i32
    %c0_i32_1 = arith.constant 0 : i32
    return %c0_i32, %c0_i32_0 : i32, i32
  }
  func.func @transform_4(%arg0: i32) -> (i32, i32) {
    %c0_i32 = arith.constant 0 : i32
    %c0_i32_0 = arith.constant 0 : i32
    %c0_i32_1 = arith.constant 0 : i32
    return %c0_i32, %c0_i32_0 : i32, i32
  }
  func.func @transform_5(%arg0: i32) -> (i32, i32) {
    %c0_i32 = arith.constant 0 : i32
    %c0_i32_0 = arith.constant 0 : i32
    %c0_i32_1 = arith.constant 0 : i32
    return %c0_i32, %c0_i32_0 : i32, i32
  }
  func.func @transform_6(%arg0: i32) -> (i32, i32) {
    %c0_i32 = arith.constant 0 : i32
    %c0_i32_0 = arith.constant 0 : i32
    %c0_i32_1 = arith.constant 0 : i32
    return %c0_i32, %c0_i32_0 : i32, i32
  }
  func.func @transform_7(%arg0: i32) -> (i32, i32) {
    %c0_i32 = arith.constant 0 : i32
    %c0_i32_0 = arith.constant 0 : i32
    %c0_i32_1 = arith.constant 0 : i32
    return %c0_i32, %c0_i32_0 : i32, i32
  }
  func.func @transform_8(%arg0: i32) -> (i32, i32) {
    %c0_i32 = arith.constant 0 : i32
    %c0_i32_0 = arith.constant 0 : i32
    %c0_i32_1 = arith.constant 0 : i32
    return %c0_i32, %c0_i32_0 : i32, i32
  }
  func.func @transform_9(%arg0: i32) -> (i32, i32) {
    %c0_i32 = arith.constant 0 : i32
    %c0_i32_0 = arith.constant 0 : i32
    %c0_i32_1 = arith.constant 0 : i32
    return %c0_i32, %c0_i32_0 : i32, i32
  }
  func.func @transform_10(%arg0: i32) -> (i32, i32) {
    %c0_i32 = arith.constant 0 : i32
    %c0_i32_0 = arith.constant 0 : i32
    %c0_i32_1 = arith.constant 0 : i32
    return %c0_i32, %c0_i32_0 : i32, i32
  }
  func.func @transform_11(%arg0: i32) -> (i32, i32) {
    %c0_i32 = arith.constant 0 : i32
    %c0_i32_0 = arith.constant 0 : i32
    %c0_i32_1 = arith.constant 0 : i32
    return %c0_i32, %c0_i32_0 : i32, i32
  }
  func.func @transform_12(%arg0: i32) -> (i32, i32) {
    %c0_i32 = arith.constant 0 : i32
    %c0_i32_0 = arith.constant 0 : i32
    %c0_i32_1 = arith.constant 0 : i32
    return %c0_i32, %c0_i32_0 : i32, i32
  }
  func.func @transform_13(%arg0: i32) -> (i32, i32) {
    %c0_i32 = arith.constant 0 : i32
    %c0_i32_0 = arith.constant 0 : i32
    %c0_i32_1 = arith.constant 0 : i32
    return %c0_i32, %c0_i32_0 : i32, i32
  }
  func.func @transform_14(%arg0: i32) -> (i32, i32) {
    %c0_i32 = arith.constant 0 : i32
    %c0_i32_0 = arith.constant 0 : i32
    %c0_i32_1 = arith.constant 0 : i32
    return %c0_i32, %c0_i32_0 : i32, i32
  }
  func.func @transform_15(%arg0: i32) -> (i32, i32) {
    %c0_i32 = arith.constant 0 : i32
    %c0_i32_0 = arith.constant 0 : i32
    %c0_i32_1 = arith.constant 0 : i32
    return %c0_i32, %c0_i32_0 : i32, i32
  }
  func.func @transform_16(%arg0: i32) -> (i32, i32) {
    %c0_i32 = arith.constant 0 : i32
    %c0_i32_0 = arith.constant 0 : i32
    %c0_i32_1 = arith.constant 0 : i32
    return %c0_i32, %c0_i32_0 : i32, i32
  }
  func.func @transform_17(%arg0: i32) -> (i32, i32) {
    %c0_i32 = arith.constant 0 : i32
    %c0_i32_0 = arith.constant 0 : i32
    %c0_i32_1 = arith.constant 0 : i32
    return %c0_i32, %c0_i32_0 : i32, i32
  }
  func.func @transform_18(%arg0: i32) -> (i32, i32) {
    %c0_i32 = arith.constant 0 : i32
    %c0_i32_0 = arith.constant 0 : i32
    %c0_i32_1 = arith.constant 0 : i32
    return %c0_i32, %c0_i32_0 : i32, i32
  }
  func.func @transform_19(%arg0: i32) -> (i32, i32) {
    %c0_i32 = arith.constant 0 : i32
    %c0_i32_0 = arith.constant 0 : i32
    %c0_i32_1 = arith.constant 0 : i32
    return %c0_i32, %c0_i32_0 : i32, i32
  }
  func.func @transform_20(%arg0: i32) -> (i32, i32) {
    %c0_i32 = arith.constant 0 : i32
    %c0_i32_0 = arith.constant 0 : i32
    %c0_i32_1 = arith.constant 0 : i32
    return %c0_i32, %c0_i32_0 : i32, i32
  }
  func.func @transform_21(%arg0: i32) -> (i32, i32) {
    %c0_i32 = arith.constant 0 : i32
    %c0_i32_0 = arith.constant 0 : i32
    %c0_i32_1 = arith.constant 0 : i32
    return %c0_i32, %c0_i32_0 : i32, i32
  }
  func.func @transform_22(%arg0: i32) -> (i32, i32) {
    %c0_i32 = arith.constant 0 : i32
    %c0_i32_0 = arith.constant 0 : i32
    %c0_i32_1 = arith.constant 0 : i32
    return %c0_i32, %c0_i32_0 : i32, i32
  }
  func.func @transform_23(%arg0: i32) -> (i32, i32) {
    %c0_i32 = arith.constant 0 : i32
    %c0_i32_0 = arith.constant 0 : i32
    %c0_i32_1 = arith.constant 0 : i32
    return %c0_i32, %c0_i32_0 : i32, i32
  }
  func.func @transform_24(%arg0: i32) -> (i32, i32) {
    %c0_i32 = arith.constant 0 : i32
    %c0_i32_0 = arith.constant 0 : i32
    %c0_i32_1 = arith.constant 0 : i32
    return %c0_i32, %c0_i32_0 : i32, i32
  }
  func.func @transform_25(%arg0: i32) -> (i32, i32) {
    %c0_i32 = arith.constant 0 : i32
    %c0_i32_0 = arith.constant 0 : i32
    %c0_i32_1 = arith.constant 0 : i32
    return %c0_i32, %c0_i32_0 : i32, i32
  }
  func.func @transform_26(%arg0: i32) -> (i32, i32) {
    %c0_i32 = arith.constant 0 : i32
    %c0_i32_0 = arith.constant 0 : i32
    %c0_i32_1 = arith.constant 0 : i32
    return %c0_i32, %c0_i32_0 : i32, i32
  }
  func.func @transform_27(%arg0: i32) -> (i32, i32) {
    %c0_i32 = arith.constant 0 : i32
    %c0_i32_0 = arith.constant 0 : i32
    %c0_i32_1 = arith.constant 0 : i32
    return %c0_i32, %c0_i32_0 : i32, i32
  }
  func.func @transform_28(%arg0: i32) -> (i32, i32) {
    %c0_i32 = arith.constant 0 : i32
    %c0_i32_0 = arith.constant 0 : i32
    return %arg0, %c0_i32 : i32, i32
  }
}

</mosaic_0001>

<bundles_post_ra>
// kernel: tpu_custom_call.1
= control target key start
LH: loop header
LB: loop body
LE: loop exit
PB: predicated region body
PF: predicated region fallthrough
CT: control target
= control target key end

     0   :  { %s2907_s0 = inlined_call_operand.hbm [shape: f32[8,128], index: 0, kind: input, shape index: {}]   ;;  %s2908_s1 = inlined_call_operand.hbm [shape: f32[1,128], index: 1, kind: input, shape index: {}]   ;;  %s2909_s2 = inlined_call_operand.hbm [shape: bf16[128,128], index: 2, kind: input, shape index: {}]   ;;  %s2910_s3 = inlined_call_operand.hbm [shape: f32[1,128], index: 3, kind: input, shape index: {}]   ;;  %s2911_s4 = inlined_call_operand.hbm [shape: f32[1,128], index: 4, kind: input, shape index: {}]   ;;  %s2912_s5 = inlined_call_operand.hbm [shape: f32[1,128], index: 5, kind: input, shape index: {}]   ;;  %s2913_s6 = inlined_call_operand.hbm [shape: bf16[128,256], index: 6, kind: input, shape index: {}]   ;;  %s2914_s7 = inlined_call_operand.vmem [shape: f32[1,256], index: 7, kind: input, shape index: {}]   ;;  %s2915_s8 = inlined_call_operand.hbm [shape: bf16[256,128], index: 8, kind: input, shape index: {}]   ;;  %s2916_s9 = inlined_call_operand.vmem [shape: f32[1,128], index: 9, kind: input, shape index: {}]   ;;  %s2917_s10 = inlined_call_operand.vmem [shape: f32[1,128], index: 10, kind: input, shape index: {}]   ;;  %s2918_s11 = inlined_call_operand.vmem [shape: f32[1,128], index: 11, kind: input, shape index: {}]   ;;  %s2919_s12 = inlined_call_operand.hbm [shape: bf16[128,128], index: 12, kind: input, shape index: {}]   ;;  %s2920_s13 = inlined_call_operand.vmem [shape: f32[1,128], index: 13, kind: input, shape index: {}]   ;;  %s2921_s14 = inlined_call_operand.vmem [shape: f32[1,128], index: 14, kind: input, shape index: {}]   ;;  %s2922_s15 = inlined_call_operand.vmem [shape: f32[1,128], index: 15, kind: input, shape index: {}]   ;;  %s2923_s16 = inlined_call_operand.hbm [shape: bf16[128,256], index: 16, kind: input, shape index: {}]   ;;  %s2924_s17 = inlined_call_operand.vmem [shape: f32[1,256], index: 17, kind: input, shape index: {}]   ;;  %s2925_s18 = inlined_call_operand.hbm [shape: bf16[256,128], index: 18, kind: input, shape index: {}]   ;;  %s2926_s19 = inlined_call_operand.vmem [shape: f32[1,128], index: 19, kind: input, shape index: {}]   ;;  %s2927_s20 = inlined_call_operand.vmem [shape: f32[1,128], index: 20, kind: input, shape index: {}]   ;;  %s2928_s21 = inlined_call_operand.vmem [shape: f32[1,128], index: 21, kind: input, shape index: {}]   ;;  %s2929_s22 = inlined_call_operand.hbm [shape: bf16[128,128], index: 22, kind: input, shape index: {}]   ;;  %s2930_s23 = inlined_call_operand.vmem [shape: f32[1,128], index: 23, kind: input, shape index: {}]   ;;  %s2931_s24 = inlined_call_operand.hbm [shape: bf16[128,256], index: 24, kind: input, shape index: {}]   ;;  %s2932_s25 = inlined_call_operand.vmem [shape: f32[1,256], index: 25, kind: input, shape index: {}]   ;;  %s2933_s26 = inlined_call_operand.hbm [shape: bf16[256,128], index: 26, kind: input, shape index: {}]   ;;  %s2934_s27 = inlined_call_operand.vmem [shape: f32[1,128], index: 27, kind: input, shape index: {}]   ;;  %s2935_s28 = inlined_call_operand.hbm [shape: f32[8,128], index: 28, kind: output, shape index: {}]  }
   0x1   :  { %2936 = sst [smem:[#allocation35_spill]] %s2907_s0 }
   0x2   :  { %2937 = sst [smem:[#allocation36_spill]] %s2908_s1 }
   0x3   :  { %2938 = sst [smem:[#allocation37_spill]] %s2909_s2 }
   0x4   :  { %2939 = sst [smem:[#allocation38_spill]] %s2910_s3 }
   0x5   :  { %2940 = sst [smem:[#allocation39_spill]] %s2911_s4 }
   0x6   :  { %2941 = sst [smem:[#allocation40_spill]] %s2912_s5 }
   0x7   :  { %2942 = sst [smem:[#allocation41_spill]] %s2913_s6 }
   0x8   :  { %2943 = sst [smem:[#allocation42_spill]] %s2914_s7 }
   0x9   :  { %2944 = sst [smem:[#allocation43_spill]] %s2915_s8 }
   0xa   :  { %2945 = sst [smem:[#allocation44_spill]] %s2916_s9 }
   0xb   :  { %2946 = sst [smem:[#allocation45_spill]] %s2917_s10 }
   0xc   :  { %2947 = sst [smem:[#allocation46_spill]] %s2918_s11 }
   0xd   :  { %2948 = sst [smem:[#allocation47_spill]] %s2919_s12 }
   0xe   :  { %2949 = sst [smem:[#allocation48_spill]] %s2932_s25 }
   0xf   :  { %2950 = sst [smem:[#allocation49_spill]] %s2934_s27 }
  0x10   :  { %2951 = sst [smem:[#allocation50_spill]] %s2935_s28 }
  0x11   :  { %33 = vsyncpa [#allocation3], 0 }
  0x12   :  { %34 = vsyncpa [#allocation6], 0 }
  0x13   :  { %35 = vsyncpa [#allocation9], 0 }
  0x14   :  { %36 = vsyncpa [#allocation12], 0 }
  0x15   :  { %37 = vsyncpa [#allocation15], 0 }
  0x16   :  { %38 = vsyncpa [#allocation18], 0 }
  0x17   :  { %39 = vsyncpa [#allocation21], 0 }
  0x18   :  { %40 = vsyncpa [#allocation24], 0  ;;  %s2952_s9 = sld [smem:[#allocation36_spill]] }
  0x1e   :  { %s58_s30 = sshll.u32 %s2952_s9, 4  ;;  %s59_s30 = int_to_ptr.hbm [resolvable:$true] %s58_s30 }
  0x1f   :  { %41 = vsyncpa [#allocation4], 0  ;;  %s2603_s3 = smov [#allocation5]   ;;  %s2953_s11 = sld [smem:[#allocation38_spill]] }
  0x20   :  { %s60_s6 = sshll.u32 %s2603_s3, 4  ;;  %s2604_s2 = smov [#allocation8]   ;;  %s61_s6 = int_to_ptr.vmem [resolvable:$true] %s60_s6 }
  0x21   :  { %63 = dma.hbm_to_vmem [thread:$0]  %s59_s30, 16, %s61_s6, [#allocation6]  }
  0x22   :  { %s84_s7 = sshll.u32 %s2604_s2, 4  ;;  %s2954_s4 = sld [smem:[#allocation40_spill]]  ;;  %s85_s7 = int_to_ptr.vmem [resolvable:$true] %s84_s7 }
  0x23   :  { %s2605_s8 = smov [#allocation11]   ;;  %s2955_s27 = sld [smem:[#allocation43_spill]] }
  0x24   :  { %s106_s5 = sshll.u32 %s2605_s8, 4  ;;  %s2606_s30 = smov [#allocation14]   ;;  %s107_s5 = int_to_ptr.vmem [resolvable:$true] %s106_s5 }
  0x25   :  { %s82_s29 = sshll.u32 %s2953_s11, 4  ;;  %s131_s6 = sshll.u32 %s2606_s30, 4  ;;  %s83_s29 = int_to_ptr.hbm [resolvable:$true] %s82_s29  ;;  %s132_s6 = int_to_ptr.vmem [resolvable:$true] %s131_s6 }
  0x26   :  { %87 = dma.hbm_to_vmem [thread:$0]  %s83_s29, 16, %s85_s7, [#allocation9]  }
  0x27   :  { %s2607_s10 = smov 64   ;;  %s2608_s0 = smov 4  }
  0x28   :  { %s104_s28 = sshll.u32 %s2954_s4, 4  ;;  %s167_s2 = sshll.u32 %s2923_s16, 4  ;;  %s105_s28 = int_to_ptr.hbm [resolvable:$true] %s104_s28  ;;  %s168_s2 = int_to_ptr.hbm [resolvable:$true] %s167_s2 }
  0x29   :  { %s129_s25 = sshll.u32 %s2955_s27, 4  ;;  %s2609_s7 = smov [#allocation17]   ;;  %s130_s25 = int_to_ptr.hbm [resolvable:$true] %s129_s25 }
  0x2a   :  { %109 = dma.hbm_to_vmem [thread:$0]  %s105_s28, 16, %s107_s5, [#allocation12]  }
  0x2b   :  { %137 = dma.hbm_to_vmem [thread:$0]  %s130_s25, 2048, %s132_s6, [#allocation15], %s2607_s10, %s2607_s10, %s2608_s0  }
  0x2c   :  { %s169_s12 = sshll.u32 %s2609_s7, 4  ;;  %s201_s1 = sshll.u32 %s2929_s22, 4  ;;  %s170_s12 = int_to_ptr.vmem [resolvable:$true] %s169_s12  ;;  %s202_s1 = int_to_ptr.hbm [resolvable:$true] %s201_s1 }
  0x2d   :  { %s2610_s4 = smov 128   ;;  %s2611_s8 = smov 8  }
  0x2e   :  { %175 = dma.hbm_to_vmem [thread:$0]  %s168_s2, 2048, %s170_s12, [#allocation18], %s2610_s4, %s2610_s4, %s2611_s8  }
  0x2f   :  { %s2612_s25 = smov [#allocation20]   ;;  %s2956_s16 = sld [smem:[#allocation35_spill]] }
  0x30   :  { %s203_s5 = sshll.u32 %s2612_s25, 4  ;;  %s2957_s11 = sld [smem:[#allocation37_spill]]  ;;  %s204_s5 = int_to_ptr.vmem [resolvable:$true] %s203_s5 }
  0x31   :  { %209 = dma.hbm_to_vmem [thread:$0]  %s202_s1, 1024, %s204_s5, [#allocation21], %s2607_s10, %s2607_s10, %s2608_s0  }
  0x32   :  { %s2613_s7 = smov [#allocation2]   ;;  %s2614_s2 = smov [#allocation7]  }
  0x33   :  { %s49_s27 = sshll.u32 %s2613_s7, 4  ;;  %s70_s12 = sshll.u32 %s2614_s2, 4  ;;  %s50_s27 = int_to_ptr.vmem [resolvable:$true] %s49_s27  ;;  %s71_s12 = int_to_ptr.vmem [resolvable:$true] %s70_s12 }
  0x34   :  { %s2958_s9 = sld [smem:[#allocation39_spill]]  ;;  %s2615_s6 = smov [#allocation10]  }
  0x35   :  { %s47_s30 = sshll.u32 %s2956_s16, 4  ;;  %s2959_s16 = sld [smem:[#allocation41_spill]]  ;;  %s48_s30 = int_to_ptr.hbm [resolvable:$true] %s47_s30 }
  0x36   :  { %s68_s29 = sshll.u32 %s2957_s11, 4  ;;  %s95_s11 = sshll.u32 %s2615_s6, 4  ;;  %s69_s29 = int_to_ptr.hbm [resolvable:$true] %s68_s29  ;;  %s96_s11 = int_to_ptr.vmem [resolvable:$true] %s95_s11 }
  0x37   :  { %52 = dma.hbm_to_vmem [thread:$0]  %s48_s30, 128, %s50_s27, [#allocation3]  }
  0x38   :  { %76 = dma.hbm_to_vmem [thread:$0]  %s69_s29, 1024, %s71_s12, [#allocation6], %s2607_s10, %s2607_s10, %s2608_s0  }
  0x39   :  { %s2616_s30 = smov [#allocation13]   ;;  %s2960_s28 = sld [smem:[#allocation47_spill]] }
  0x3a   :  { %s93_s3 = sshll.u32 %s2958_s9, 4  ;;  %s116_s7 = sshll.u32 %s2616_s30, 4  ;;  %s94_s3 = int_to_ptr.hbm [resolvable:$true] %s93_s3  ;;  %s117_s7 = int_to_ptr.vmem [resolvable:$true] %s116_s7 }
  0x3b   :  { %s114_s22 = sshll.u32 %s2959_s16, 4  ;;  %s182_s9 = sshll.u32 %s2925_s18, 4  ;;  %s115_s22 = int_to_ptr.hbm [resolvable:$true] %s114_s22  ;;  %s183_s9 = int_to_ptr.hbm [resolvable:$true] %s182_s9 }
  0x3c   :  { %98 = dma.hbm_to_vmem [thread:$0]  %s94_s3, 16, %s96_s11, [#allocation9]  }
  0x3d   :  { %122 = dma.hbm_to_vmem [thread:$0]  %s115_s22, 2048, %s117_s7, [#allocation12], %s2610_s4, %s2610_s4, %s2611_s8  }
  0x3e   :  { %s2617_s1 = smov [#allocation16]   ;;  %s2618_s3 = smov [#allocation19]  }
  0x3f   :  { %s148_s25 = sshll.u32 %s2960_s28, 4  ;;  %s150_s5 = sshll.u32 %s2617_s1, 4  ;;  %s149_s25 = int_to_ptr.hbm [resolvable:$true] %s148_s25  ;;  %s151_s5 = int_to_ptr.vmem [resolvable:$true] %s150_s5 }
  0x40   :  { %156 = dma.hbm_to_vmem [thread:$0]  %s149_s25, 1024, %s151_s5, [#allocation15], %s2607_s10, %s2607_s10, %s2608_s0  }
  0x41   :  { %s184_s16 = sshll.u32 %s2618_s3, 4  ;;  %s216_s30 = sshll.u32 %s2931_s24, 4  ;;  %s185_s16 = int_to_ptr.vmem [resolvable:$true] %s184_s16  ;;  %s217_s30 = int_to_ptr.hbm [resolvable:$true] %s216_s30 }
  0x42   :  { %190 = dma.hbm_to_vmem [thread:$0]  %s183_s9, 2048, %s185_s16, [#allocation18], %s2607_s10, %s2607_s10, %s2608_s0  }
  0x43   :  { %s231_s7 = sshll.u32 %s2933_s26, 4  ;;  %s2619_s27 = smov [#allocation22]   ;;  %s232_s7 = int_to_ptr.hbm [resolvable:$true] %s231_s7 }
  0x44   :  { %s218_s2 = sshll.u32 %s2619_s27, 4  ;;  %s2620_s28 = smov [#allocation23]   ;;  %s219_s2 = int_to_ptr.vmem [resolvable:$true] %s218_s2 }
  0x45   :  { %224 = dma.hbm_to_vmem [thread:$0]  %s217_s30, 2048, %s219_s2, [#allocation21], %s2610_s4, %s2610_s4, %s2611_s8  }
  0x46   :  { %s233_s24 = sshll.u32 %s2620_s28, 4  ;;  %s234_s24 = int_to_ptr.vmem [resolvable:$true] %s233_s24 }
  0x47   :  { %239 = dma.hbm_to_vmem [thread:$0]  %s232_s7, 2048, %s234_s24, [#allocation24], %s2607_s10, %s2607_s10, %s2608_s0  }
  0x48   :  { %2585 = dma.done.wait [#allocation3], 128  }
  0x49   :  { %2586 = vsyncadd [#allocation3], 4294967168 }
  0x4a   :  { %2587 = dma.done.wait [#allocation6], 1040  }
  0x4b   :  { %2588 = vsyncadd [#allocation6], 4294966256 }
  0x4c   :  { %2589 = dma.done.wait [#allocation9], 32  }
  0x4d   :  { %2590 = vsyncadd [#allocation9], 4294967264 }
  0x4e   :  { %2591 = dma.done.wait [#allocation12], 2064  }
  0x4f   :  { %2592 = vsyncadd [#allocation12], 4294965232 }
  0x50   :  { %2593 = dma.done.wait [#allocation15], 3072  }
  0x51   :  { %2594 = vsyncadd [#allocation15], 4294964224 }
  0x52   :  { %2595 = dma.done.wait [#allocation18], 4096  }
  0x53   :  { %2596 = vsyncadd [#allocation18], 4294963200 }
  0x54   :  { %2597 = dma.done.wait [#allocation21], 3072  }
  0x55   :  { %2598 = vsyncadd [#allocation21], 4294964224 }
  0x56   :  { %2599 = dma.done.wait [#allocation24], 2048  }
  0x57   :  { %2600 = vsyncadd [#allocation24], 4294965248  ;;  %v2067_v0 = vld [vmem:[#allocation7 + $0x38] sm:$0xff]  ;;  %v2066_v1 = vld [vmem:[#allocation7 + $0x30] sm:$0xff]  ;;  %v2621_v18 = vmov 128.0   ;;  %s2961_s0 = sld [smem:[#allocation42_spill]] }
  0x58   :  { %374 = vmatpush.bf16.msra.mxu0 %v2067_v0  ;;  %v2065_v2 = vld [vmem:[#allocation7 + $0x28] sm:$0xff]  ;;  %v2064_v3 = vld [vmem:[#allocation7 + $0x20] sm:$0xff]  ;;  %v2063_v4 = vld [vmem:[#allocation7 + $0x18] sm:$0xff]  ;;  %2215 = vrcp.f32 %v2621_v18  ;;  %s2962_s25 = sld [smem:[#allocation44_spill]]  ;;  %s2622_s4 = smov [#allocation25]  }
  0x59   :  { %v2062_v5 = vld [vmem:[#allocation7 + $0x10] sm:$0xff]  ;;  %v2200_v8 = vld [vmem:[#allocation5] ss:$0 sm:$0xff]  ;;  %v2061_v9 = vld [vmem:[#allocation7 + $0x8] sm:$0xff]  ;;  %s2963_s9 = sld [smem:[#allocation45_spill]]  ;;  %s1561_s8 = sshll.u32 %s2622_s4, 4  ;;  %s1562_s8 = int_to_ptr.vmem [resolvable:$true] %s1561_s8 }
  0x5a   :  { %v299_v6 = vld [vmem:[#allocation2] sm:$0xff]  ;;  %v2060_v11 = vld [vmem:[#allocation7] sm:$0xff]  ;;  %v2081_v36 = vld [vmem:[#allocation13 + $0x64] sm:$0xf0]  ;;  %s2964_s3 = sld [smem:[#allocation46_spill]] }
  0x5b   :  { %v300_v7 = vmul.f32 11.313708, %v299_v6  ;;  %v2201_v13 = vld [vmem:[#allocation8] ss:$0 sm:$0xff]  ;;  %v1670_v19 = vld [vmem:[#allocation13 + $0x70] sm:$0xf] }
  0x5c   :  { %375 = vmatpush.bf16.msra.mxu0 %v2066_v1  ;;  %v2083_v20 = vld [vmem:[#allocation13 + $0x74] sm:$0xf0]  ;;  %v2082_v21 = vld [vmem:[#allocation13 + $0x74] sm:$0xf]  ;;  %v1672_v23 = vld [vmem:[#allocation13 + $0x78] sm:$0xf0] }
  0x5d   :  { %v304_v10 = vadd.f32 %v2200_v8, %v300_v7  ;;  %v1671_v22 = vor.u32 %v2083_v20, %v1670_v19  ;;  %v1675_v24 = vor.u32 %v2082_v21, %v1672_v23  ;;  %v1662_v35 = vld [vmem:[#allocation13 + $0x60] sm:$0xf]  ;;  %v2080_v37 = vld [vmem:[#allocation13 + $0x64] sm:$0xf]  ;;  %v1664_v39 = vld [vmem:[#allocation13 + $0x68] sm:$0xf0] }
  0x5e   :  { %v2216_v25 = vpop.eup %2215  ;;  %v1663_v38 = vor.u32 %v2081_v36, %v1662_v35  ;;  %v1667_v40 = vor.u32 %v2080_v37, %v1664_v39  ;;  %v1654_v41 = vld [vmem:[#allocation13 + $0x50] sm:$0xf]  ;;  %v2079_v42 = vld [vmem:[#allocation13 + $0x54] sm:$0xf0]  ;;  %v2078_v43 = vld [vmem:[#allocation13 + $0x54] sm:$0xf] }
  0x5f   :  { %v321_v12 = vpack.c.bf16 %v304_v10, %v304_v10  ;;  %528 = vmatpush.bf16.msra.mxu1 %v1671_v22  ;;  %541 = vmatpush.bf16.msra.mxu2 %v1675_v24  ;;  %v393_v26 = vmul.f32 128.0, %v2216_v25  ;;  %vm397_vm0 = vweird.f32 %v2216_v25  ;;  %v1655_v44 = vor.u32 %v2079_v42, %v1654_v41  ;;  %v1656_v45 = vld [vmem:[#allocation13 + $0x58] sm:$0xf0]  ;;  %v1646_v47 = vld [vmem:[#allocation13 + $0x40] sm:$0xf]  ;;  %v2098_v18 = vld [vmem:[#allocation14 + $0x70] sm:$0xff] }
  0x60   :  { %376 = vmatpush.bf16.msra.mxu0 %v2065_v2  ;;  %v1659_v46 = vor.u32 %v2078_v43, %v1656_v45  ;;  %v2077_v48 = vld [vmem:[#allocation13 + $0x44] sm:$0xf0]  ;;  %v2076_v49 = vld [vmem:[#allocation13 + $0x44] sm:$0xf]  ;;  %v1648_v51 = vld [vmem:[#allocation13 + $0x48] sm:$0xf0] }
  0x61   :  { %v394_v27 = vsub.f32 1.0, %v393_v26  ;;  %v1647_v50 = vor.u32 %v2077_v48, %v1646_v47  ;;  %v1651_v52 = vor.u32 %v2076_v49, %v1648_v51  ;;  %v1638_v53 = vld [vmem:[#allocation13 + $0x30] sm:$0xf]  ;;  %v2075_v54 = vld [vmem:[#allocation13 + $0x34] sm:$0xf0]  ;;  %v2089_v20 = vld [vmem:[#allocation14 + $0x28] sm:$0xff] }
  0x62   :  { %v2074_v55 = vld [vmem:[#allocation13 + $0x34] sm:$0xf]  ;;  %v1639_v56 = vor.u32 %v2075_v54, %v1638_v53  ;;  %v1640_v57 = vld [vmem:[#allocation13 + $0x38] sm:$0xf0]  ;;  %v1630_v59 = vld [vmem:[#allocation13 + $0x20] sm:$0xf] }
  0x63   :  { %v395_v28 = vmul.f32 %v2216_v25, %v394_v27  ;;  %529 = vmatpush.bf16.msra.mxu1 %v1663_v38  ;;  %542 = vmatpush.bf16.msra.mxu2 %v1667_v40  ;;  %v1643_v58 = vor.u32 %v2074_v55, %v1640_v57  ;;  %v2073_v60 = vld [vmem:[#allocation13 + $0x24] sm:$0xf0]  ;;  %v2072_v61 = vld [vmem:[#allocation13 + $0x24] sm:$0xf]  ;;  %v1632_v63 = vld [vmem:[#allocation13 + $0x28] sm:$0xf0] }
  0x64   :  { %377 = vmatpush.bf16.msra.mxu0 %v2064_v3  ;;  %v1631_v62 = vor.u32 %v2073_v60, %v1630_v59  ;;  %v1635_v0 = vor.u32 %v2072_v61, %v1632_v63  ;;  %v1622_v1 = vld [vmem:[#allocation13 + $0x10] sm:$0xf]  ;;  %v2071_v2 = vld [vmem:[#allocation13 + $0x14] sm:$0xf0]  ;;  %v2070_v3 = vld [vmem:[#allocation13 + $0x14] sm:$0xf] }
  0x65   :  { %v396_v29 = vadd.f32 %v2216_v25, %v395_v28  ;;  %v1614_v6 = vld [vmem:[#allocation13] sm:$0xf]  ;;  %v2069_v7 = vld [vmem:[#allocation13 + $0x4] sm:$0xf0]  ;;  %v2087_v26 = vld [vmem:[#allocation14 + $0x18] sm:$0xff]  ;;  %s2967_s12 = sld [smem:[#allocation50_spill]] }
  0x66   :  { %v2097_v21 = vld [vmem:[#allocation14 + $0x68] sm:$0xff]  ;;  %v2088_v22 = vld [vmem:[#allocation14 + $0x20] sm:$0xff]  ;;  %v2095_v27 = vld [vmem:[#allocation14 + $0x58] sm:$0xff] }
  0x67   :  { %v2837_v30 = vsel %vm397_vm0, %v2216_v25, %v396_v29  ;;  %530 = vmatpush.bf16.msra.mxu1 %v1655_v44  ;;  %543 = vmatpush.bf16.msra.mxu2 %v1659_v46  ;;  %v2096_v23 = vld [vmem:[#allocation14 + $0x60] sm:$0xff]  ;;  %v2202_v35 = vld [vmem:[#allocation10] ss:$0 sm:$0xff]  ;;  %v2203_v38 = vld [vmem:[#allocation11] ss:$0 sm:$0xff] }
  0x68   :  { %378 = vmatpush.bf16.msra.mxu0 %v2063_v4  ;;  %v1623_v4 = vor.u32 %v2071_v2, %v1622_v1  ;;  %v2085_v42 = vld [vmem:[#allocation14 + $0x8] sm:$0xff]  ;;  %v2094_v43 = vld [vmem:[#allocation14 + $0x50] sm:$0xff]  ;;  %v2084_v44 = vld [vmem:[#allocation14] sm:$0xff] }
  0x69   :  { %v2093_v45 = vld [vmem:[#allocation14 + $0x48] sm:$0xff]  ;;  %v2092_v46 = vld [vmem:[#allocation14 + $0x40] sm:$0xff]  ;;  %v2204_v59 = vld [vmem:[%s2962_s25] ss:$0 sm:$0xff] }
  0x6b   :  { %531 = vmatpush.bf16.msra.mxu1 %v1647_v50  ;;  %544 = vmatpush.bf16.msra.mxu2 %v1651_v52 }
  0x6c   :  { %379 = vmatpush.bf16.msra.mxu0 %v2062_v5  ;;  %v1624_v5 = vld [vmem:[#allocation13 + $0x18] sm:$0xf0] }
  0x6d   :  { %v1627_v8 = vor.u32 %v2070_v3, %v1624_v5  ;;  %v2107_v3 = vld [vmem:[#allocation16 + $0x38] sm:$0xff] }
  0x6f   :  { %532 = vmatpush.bf16.msra.mxu1 %v1639_v56  ;;  %545 = vmatpush.bf16.msra.mxu2 %v1643_v58 }
  0x70   :  { %380 = vmatpush.bf16.msra.mxu0 %v2061_v9  ;;  %v2068_v9 = vld [vmem:[#allocation13 + $0x4] sm:$0xf] }
  0x73   :  { %533 = vmatpush.bf16.msra.mxu1 %v1631_v62  ;;  %546 = vmatpush.bf16.msra.mxu2 %v1635_v0 }
  0x74   :  { %381 = vmatpush.bf16.msra.mxu0 %v2060_v11  ;;  %v1615_v11 = vor.u32 %v2069_v7, %v1614_v6 }
  0x77   :  { %382 = vmatmul.bf16.vlgmr.msra.gmra.mxu0 %v321_v12  ;;  %534 = vmatpush.bf16.msra.mxu1 %v1623_v4 }
  0x78   :  { %547 = vmatpush.bf16.msra.mxu2 %v1627_v8  ;;  %v2106_v8 = vld [vmem:[#allocation16 + $0x30] sm:$0xff] }
  0x7b   :  { %535 = vmatpush.bf16.msra.mxu1 %v1615_v11  ;;  %v2103_v11 = vld [vmem:[#allocation16 + $0x18] sm:$0xff] }
  0x7f   :  { %816 = vmatpush.bf16.msrb.mxu1 %v2107_v3  ;;  %v2114_v3 = vld [vmem:[#allocation17 + $0x34] sm:$0xf] }
  0x83   :  { %817 = vmatpush.bf16.msrb.mxu1 %v2106_v8  ;;  %v2113_v8 = vld [vmem:[#allocation17 + $0x24] sm:$0xf0] }
  0xf4   :  { %v383_v14 = vpop.f32.mrf.mxu0 }
  0xf5   :  { %v384_v15 = vadd.f32 %v2201_v13, %v383_v14  ;;  %v2091_v13 = vld [vmem:[#allocation14 + $0x38] sm:$0xff] }
  0xf6   :  { %v2099_v14 = vld [vmem:[#allocation14 + $0x78] sm:$0xff]  ;;  %690 = vmatpush.bf16.msra.mxu3 %v2091_v13  ;;  %v2101_v13 = vld [vmem:[#allocation16 + $0x8] sm:$0xff] }
  0xf7   :  { %v387_v16 = vadd.f32 %v384_v15, %v304_v10  ;;  %v1616_v10 = vld [vmem:[#allocation13 + $0x8] sm:$0xf0]  ;;  %703 = vmatpush.bf16.msrb.mxu0 %v2099_v14  ;;  %v2100_v14 = vld [vmem:[#allocation16] sm:$0xff] }
  0xf8   :  { %v1619_v12 = vor.u32 %v2068_v9, %v1616_v10  ;;  %v2105_v9 = vld [vmem:[#allocation16 + $0x28] sm:$0xff]  ;;  %v2104_v10 = vld [vmem:[#allocation16 + $0x20] sm:$0xff] }
  0xf9   :  { %390 = vadd.xlane.f32.xlu0 %v387_v16  ;;  %818 = vmatpush.bf16.msrb.mxu1 %v2105_v9  ;;  %v2112_v9 = vld [vmem:[#allocation17 + $0x24] sm:$0xf] }
  0xfa   :  { %548 = vmatpush.bf16.msra.mxu2 %v1619_v12  ;;  %v2102_v12 = vld [vmem:[#allocation16 + $0x10] sm:$0xff] }
  0xfb   :  { %704 = vmatpush.bf16.msrb.mxu0 %v2098_v18 }
  0xfc   :  { %v385_v17 = vpop.f32.mrf.mxu0 }
  0xfd   :  { %v2090_v17 = vld [vmem:[#allocation14 + $0x30] sm:$0xff]  ;;  %819 = vmatpush.bf16.msrb.mxu1 %v2104_v10 }
  0xfe   :  { %691 = vmatpush.bf16.msra.mxu3 %v2090_v17 }
  0xff   :  { %705 = vmatpush.bf16.msrb.mxu0 %v2097_v21 }
 0x101   :  { %820 = vmatpush.bf16.msrb.mxu1 %v2103_v11  ;;  %v1792_v11 = vld [vmem:[#allocation17 + $0x28] sm:$0xf0] }
 0x102   :  { %692 = vmatpush.bf16.msra.mxu3 %v2089_v20 }
 0x103   :  { %706 = vmatpush.bf16.msrb.mxu0 %v2096_v23 }
 0x105   :  { %821 = vmatpush.bf16.msrb.mxu1 %v2102_v12  ;;  %v1795_v12 = vor.u32 %v2112_v9, %v1792_v11 }
 0x106   :  { %693 = vmatpush.bf16.msra.mxu3 %v2088_v22 }
 0x107   :  { %707 = vmatpush.bf16.msrb.mxu0 %v2095_v27  ;;  %v2206_v27 = vld [vmem:[%s2964_s3] ss:$0 sm:$0xff] }
 0x109   :  { %822 = vmatpush.bf16.msrb.mxu1 %v2101_v13  ;;  %v1782_v13 = vld [vmem:[#allocation17 + $0x10] sm:$0xf] }
 0x10a   :  { %694 = vmatpush.bf16.msra.mxu3 %v2087_v26 }
 0x10b   :  { %708 = vmatpush.bf16.msrb.mxu0 %v2094_v43 }
 0x10d   :  { %823 = vmatpush.bf16.msrb.mxu1 %v2100_v14  ;;  %v2111_v14 = vld [vmem:[#allocation17 + $0x14] sm:$0xf0] }
 0x10f   :  { %709 = vmatpush.bf16.msrb.mxu0 %v2093_v45 }
 0x113   :  { %710 = vmatpush.bf16.msrb.mxu0 %v2092_v46 }
 0x16c   :  { %v391_v31 = vpop.xlane.xlu0 %390 }
 0x16d   :  { %v399_v32 = vmul.f32 %v2837_v30, %v391_v31  ;;  %v2086_v31 = vld [vmem:[#allocation14 + $0x10] sm:$0xff] }
 0x16e   :  { %695 = vmatpush.bf16.msra.mxu3 %v2086_v31 }
 0x16f   :  { %v2840_v33 = vsub.f32 %v387_v16, %v399_v32 }
 0x171   :  { %v401_v34 = vmul.f32 %v2840_v33, %v2840_v33 }
 0x172   :  { %696 = vmatpush.bf16.msra.mxu3 %v2085_v42  ;;  %v1832_v42 = vld [vmem:[#allocation17 + $0x78] sm:$0xf0] }
 0x173   :  { %402 = vadd.xlane.f32.xlu0 %v401_v34 }
 0x176   :  { %697 = vmatpush.bf16.msra.mxu3 %v2084_v44 }
 0x1e6   :  { %v403_v15 = vpop.xlane.xlu0 %402 }
 0x1e7   :  { %v404_v16 = vmul.f32 %v403_v15, %v2837_v30 }
 0x1e9   :  { %v405_v19 = vadd.f32 1e-05, %v404_v16 }
 0x1eb   :  { %2217 = vrsqrt.f32 %v405_v19  ;;  %vm412_vm2 = vweird.f32 %v405_v19 }
 0x1f1   :  { %v2218_v24 = vpop.eup %2217 }
 0x1f2   :  { %v407_v25 = vmul.f32 %v2218_v24, %v405_v19  ;;  %vm413_vm1 = vweird.f32 %v2218_v24 }
 0x1f3   :  { %vm414_vm3 = vmor %vm412_vm2, %vm413_vm1 }
 0x1f4   :  { %v408_v28 = vmul.f32 %v2218_v24, %v407_v25 }
 0x1f6   :  { %v409_v29 = vmul.f32 0.5, %v408_v28 }
 0x1f8   :  { %v410_v32 = vsub.f32 1.5, %v409_v29 }
 0x1fa   :  { %v411_v34 = vmul.f32 %v2218_v24, %v410_v32  ;;  %v2207_v32 = vld [vmem:[%s2920_s13] ss:$0 sm:$0xff] }
 0x1fc   :  { %v415_v36 = vsel %vm414_vm3, %v2218_v24, %v411_v34  ;;  %v2205_v24 = vld [vmem:[%s2963_s9] ss:$0 sm:$0xff]  ;;  %s1563_s9 = sshll.u32 %s2967_s12, 4  ;;  %s1564_s9 = int_to_ptr.hbm [resolvable:$true] %s1563_s9 }
 0x1fd   :  { %v416_v37 = vmul.f32 %v415_v36, %v2840_v33  ;;  %v442_v33 = vld [vmem:[%s2961_s0] sm:$0x3]  ;;  %s2966_s0 = sld [smem:[#allocation49_spill]] }
 0x1fe   :  { %v444_v47 = vperm.slane %v442_v33, 0  ;;  %v445_v51 = vperm.slane %v442_v33, 1 }
 0x1ff   :  { %v420_v39 = vmul.f32 %v2202_v35, %v416_v37 }
 0x201   :  { %v424_v40 = vadd.f32 %v2203_v38, %v420_v39  ;;  %v1830_v38 = vld [vmem:[#allocation17 + $0x70] sm:$0xf]  ;;  %v2123_v39 = vld [vmem:[#allocation17 + $0x74] sm:$0xf0] }
 0x203   :  { %v441_v41 = vpack.c.bf16 %v424_v40, %v424_v40 }
 0x205   :  { %536 = vmatmul.bf16.vlgmr.msra.gmra.mxu1 %v441_v41  ;;  %549 = vmatmul.bf16.vlgmr.msra.gmra.mxu2 %v441_v41  ;;  %v1831_v41 = vor.u32 %v2123_v39, %v1830_v38 }
 0x207   :  { %963 = vmatpush.bf16.msrb.mxu2 %v1831_v41  ;;  %v2135_v41 = vld [vmem:[#allocation19 + $0x58] sm:$0xff] }
 0x282   :  { %v537_v48 = vpop.f32.mrf.mxu1 }
 0x283   :  { %v538_v49 = vadd.f32 %v537_v48, %v444_v47  ;;  %v1822_v47 = vld [vmem:[#allocation17 + $0x60] sm:$0xf]  ;;  %v2121_v48 = vld [vmem:[#allocation17 + $0x64] sm:$0xf0] }
 0x285   :  { %v554_v50 = vmax.f32 %v538_v49, 0.0  ;;  %v2120_v49 = vld [vmem:[#allocation17 + $0x64] sm:$0xf] }
 0x287   :  { %v588_v52 = vpack.c.bf16 %v554_v50, %v554_v50  ;;  %v1823_v50 = vor.u32 %v2121_v48, %v1822_v47  ;;  %v2208_v48 = vld [vmem:[%s2921_s14] ss:$0 sm:$0xff] }
 0x288   :  { %v550_v53 = vpop.f32.mrf.mxu2 }
 0x289   :  { %v551_v54 = vadd.f32 %v550_v53, %v445_v51  ;;  %698 = vmatmul.bf16.vlgmr.msra.gmra.mxu3 %v588_v52  ;;  %v1824_v51 = vld [vmem:[#allocation17 + $0x68] sm:$0xf0]  ;;  %964 = vmatpush.bf16.msrb.mxu2 %v1823_v50  ;;  %v1814_v53 = vld [vmem:[#allocation17 + $0x50] sm:$0xf] }
 0x28a   :  { %v539_v55 = vpop.f32.mrf.mxu1  ;;  %v1827_v52 = vor.u32 %v2120_v49, %v1824_v51  ;;  %v2209_v51 = vld [vmem:[%s2922_s15] ss:$0 sm:$0xff] }
 0x28b   :  { %v555_v56 = vmax.f32 %v551_v54, 0.0  ;;  %v2119_v54 = vld [vmem:[#allocation17 + $0x54] sm:$0xf0]  ;;  %v2118_v55 = vld [vmem:[#allocation17 + $0x54] sm:$0xf] }
 0x28d   :  { %v589_v57 = vpack.c.bf16 %v555_v56, %v555_v56  ;;  %v1815_v56 = vor.u32 %v2119_v54, %v1814_v53 }
 0x28f   :  { %711 = vmatmul.bf16.vlgmr.msrb.gmra.mxu0 %v589_v57  ;;  %v1816_v57 = vld [vmem:[#allocation17 + $0x58] sm:$0xf0]  ;;  %965 = vmatpush.bf16.msrb.mxu2 %v1815_v56  ;;  %v2133_v56 = vld [vmem:[#allocation19 + $0x48] sm:$0xff] }
 0x290   :  { %v552_v58 = vpop.f32.mrf.mxu2 }
 0x291   :  { %v1819_v58 = vor.u32 %v2118_v55, %v1816_v57  ;;  %v2125_v55 = vld [vmem:[#allocation19 + $0x8] sm:$0xff]  ;;  %v2124_v57 = vld [vmem:[#allocation19] sm:$0xff] }
 0x30c   :  { %v699_v60 = vpop.f32.mrf.mxu3  ;;  %v712_v61 = vpop.f32.mrf.mxu0 }
 0x30d   :  { %v700_v62 = vadd.f32 %v2204_v59, %v699_v60  ;;  %v1806_v59 = vld [vmem:[#allocation17 + $0x40] sm:$0xf]  ;;  %v2117_v60 = vld [vmem:[#allocation17 + $0x44] sm:$0xf0] }
 0x30f   :  { %v713_v63 = vadd.f32 %v712_v61, %v700_v62  ;;  %v2116_v61 = vld [vmem:[#allocation17 + $0x44] sm:$0xf]  ;;  %v1807_v62 = vor.u32 %v2117_v60, %v1806_v59 }
 0x311   :  { %v716_v0 = vadd.f32 %v713_v63, %v424_v40  ;;  %v2122_v40 = vld [vmem:[#allocation17 + $0x74] sm:$0xf]  ;;  %v1808_v63 = vld [vmem:[#allocation17 + $0x48] sm:$0xf0]  ;;  %966 = vmatpush.bf16.msrb.mxu2 %v1807_v62 }
 0x312   :  { %v1835_v43 = vor.u32 %v2122_v40, %v1832_v42  ;;  %v2127_v40 = vld [vmem:[#allocation19 + $0x18] sm:$0xff] }
 0x313   :  { %719 = vadd.xlane.f32.xlu1 %v716_v0 }
 0x314   :  { %v701_v1 = vpop.f32.mrf.mxu3  ;;  %v714_v2 = vpop.f32.mrf.mxu0  ;;  %976 = vmatpush.bf16.msrb.mxu3 %v1835_v43 }
 0x315   :  { %v1798_v1 = vld [vmem:[#allocation17 + $0x30] sm:$0xf]  ;;  %v2115_v2 = vld [vmem:[#allocation17 + $0x34] sm:$0xf0] }
 0x318   :  { %977 = vmatpush.bf16.msrb.mxu3 %v1827_v52 }
 0x31c   :  { %978 = vmatpush.bf16.msrb.mxu3 %v1819_v58  ;;  %v2132_v58 = vld [vmem:[#allocation19 + $0x40] sm:$0xff] }
 0x386   :  { %v720_v4 = vpop.xlane.xlu1 %719 }
 0x387   :  { %v721_v5 = vmul.f32 %v720_v4, %v2837_v30  ;;  %v1799_v4 = vor.u32 %v2115_v2, %v1798_v1 }
 0x389   :  { %v722_v6 = vsub.f32 %v716_v0, %v721_v5  ;;  %v1811_v0 = vor.u32 %v2116_v61, %v1808_v63  ;;  %v1800_v5 = vld [vmem:[#allocation17 + $0x38] sm:$0xf0]  ;;  %967 = vmatpush.bf16.msrb.mxu2 %v1799_v4 }
 0x38b   :  { %v723_v7 = vmul.f32 %v722_v6, %v722_v6  ;;  %979 = vmatpush.bf16.msrb.mxu3 %v1811_v0 }
 0x38d   :  { %724 = vadd.xlane.f32.xlu1 %v723_v7  ;;  %v1790_v7 = vld [vmem:[#allocation17 + $0x20] sm:$0xf] }
 0x38e   :  { %v1791_v10 = vor.u32 %v2113_v8, %v1790_v7  ;;  %v2210_v7 = vld [vmem:[%s2926_s19] ss:$0 sm:$0xff] }
 0x390   :  { %968 = vmatpush.bf16.msrb.mxu2 %v1791_v10 }
 0x400   :  { %v725_v15 = vpop.xlane.xlu1 %724 }
 0x401   :  { %v726_v16 = vmul.f32 %v725_v15, %v2837_v30  ;;  %v2110_v15 = vld [vmem:[#allocation17 + $0x14] sm:$0xf] }
 0x403   :  { %v727_v17 = vadd.f32 1e-05, %v726_v16  ;;  %v1783_v16 = vor.u32 %v2111_v14, %v1782_v13 }
 0x405   :  { %2219 = vrsqrt.f32 %v727_v17  ;;  %vm734_vm5 = vweird.f32 %v727_v17  ;;  %969 = vmatpush.bf16.msrb.mxu2 %v1783_v16 }
 0x40b   :  { %v2220_v18 = vpop.eup %2219 }
 0x40c   :  { %v729_v19 = vmul.f32 %v2220_v18, %v727_v17  ;;  %vm735_vm4 = vweird.f32 %v2220_v18  ;;  %v1784_v17 = vld [vmem:[#allocation17 + $0x18] sm:$0xf0] }
 0x40d   :  { %vm736_vm6 = vmor %vm734_vm5, %vm735_vm4 }
 0x40e   :  { %v730_v20 = vmul.f32 %v2220_v18, %v729_v19  ;;  %v1774_v19 = vld [vmem:[#allocation17] sm:$0xf] }
 0x410   :  { %v731_v21 = vmul.f32 0.5, %v730_v20  ;;  %v2109_v20 = vld [vmem:[#allocation17 + $0x4] sm:$0xf0] }
 0x412   :  { %v732_v22 = vsub.f32 1.5, %v731_v21  ;;  %v2108_v21 = vld [vmem:[#allocation17 + $0x4] sm:$0xf] }
 0x414   :  { %v733_v23 = vmul.f32 %v2220_v18, %v732_v22  ;;  %v1775_v22 = vor.u32 %v2109_v20, %v1774_v19  ;;  %v2146_v20 = vld [vmem:[#allocation20 + $0x30] sm:$0xff] }
 0x416   :  { %v737_v25 = vsel %vm736_vm6, %v2220_v18, %v733_v23  ;;  %v1787_v18 = vor.u32 %v2110_v15, %v1784_v17  ;;  %v1776_v23 = vld [vmem:[#allocation17 + $0x8] sm:$0xf0]  ;;  %970 = vmatpush.bf16.msrb.mxu2 %v1775_v22  ;;  %v2147_v15 = vld [vmem:[#allocation20 + $0x38] sm:$0xff]  ;;  %v2144_v22 = vld [vmem:[#allocation20 + $0x20] sm:$0xff] }
 0x417   :  { %v738_v26 = vmul.f32 %v737_v25, %v722_v6  ;;  %v1803_v6 = vor.u32 %v2114_v3, %v1800_v5  ;;  %v2131_v25 = vld [vmem:[#allocation19 + $0x38] sm:$0xff] }
 0x418   :  { %1125 = vmatpush.bf16.msra.mxu0 %v2131_v25  ;;  %v2141_v25 = vld [vmem:[#allocation20 + $0x8] sm:$0xff] }
 0x419   :  { %v742_v28 = vmul.f32 %v2205_v24, %v738_v26  ;;  %980 = vmatpush.bf16.msrb.mxu3 %v1803_v6  ;;  %v1779_v24 = vor.u32 %v2108_v21, %v1776_v23  ;;  %v2139_v26 = vld [vmem:[#allocation19 + $0x78] sm:$0xff]  ;;  %v2145_v21 = vld [vmem:[#allocation20 + $0x28] sm:$0xff] }
 0x41a   :  { %1138 = vmatpush.bf16.msra.mxu1 %v2139_v26  ;;  %1251 = vmatpush.bf16.msra.mxu2 %v2147_v15  ;;  %v2143_v23 = vld [vmem:[#allocation20 + $0x18] sm:$0xff]  ;;  %v2140_v26 = vld [vmem:[#allocation20] sm:$0xff] }
 0x41b   :  { %v746_v29 = vadd.f32 %v2206_v27, %v742_v28 }
 0x41d   :  { %v763_v31 = vpack.c.bf16 %v746_v29, %v746_v29  ;;  %981 = vmatpush.bf16.msrb.mxu3 %v1795_v12 }
 0x41e   :  { %1252 = vmatpush.bf16.msra.mxu2 %v2146_v20 }
 0x41f   :  { %824 = vmatmul.bf16.vlgmr.msrb.gmra.mxu1 %v763_v31  ;;  %v2138_v31 = vld [vmem:[#allocation19 + $0x70] sm:$0xff] }
 0x420   :  { %1139 = vmatpush.bf16.msra.mxu1 %v2138_v31 }
 0x421   :  { %982 = vmatpush.bf16.msrb.mxu3 %v1787_v18 }
 0x422   :  { %1253 = vmatpush.bf16.msra.mxu2 %v2145_v21 }
 0x425   :  { %983 = vmatpush.bf16.msrb.mxu3 %v1779_v24  ;;  %v2142_v24 = vld [vmem:[#allocation20 + $0x10] sm:$0xff] }
 0x426   :  { %1254 = vmatpush.bf16.msra.mxu2 %v2144_v22  ;;  %v1934_v22 = vld [vmem:[#allocation22] sm:$0xf] }
 0x42a   :  { %1255 = vmatpush.bf16.msra.mxu2 %v2143_v23  ;;  %v2149_v23 = vld [vmem:[#allocation22 + $0x4] sm:$0xf0] }
 0x42e   :  { %1256 = vmatpush.bf16.msra.mxu2 %v2142_v24  ;;  %v2148_v24 = vld [vmem:[#allocation22 + $0x4] sm:$0xf] }
 0x432   :  { %1257 = vmatpush.bf16.msra.mxu2 %v2141_v25  ;;  %v1935_v25 = vor.u32 %v2149_v23, %v1934_v22 }
 0x436   :  { %1258 = vmatpush.bf16.msra.mxu2 %v2140_v26  ;;  %v1936_v26 = vld [vmem:[#allocation22 + $0x8] sm:$0xf0] }
 0x49c   :  { %v825_v34 = vpop.f32.mrf.mxu1 }
 0x49d   :  { %v826_v35 = vadd.f32 %v2207_v32, %v825_v34  ;;  %v2129_v34 = vld [vmem:[#allocation19 + $0x28] sm:$0xff] }
 0x49f   :  { %v829_v36 = vadd.f32 %v826_v35, %v746_v29  ;;  %v2130_v29 = vld [vmem:[#allocation19 + $0x30] sm:$0xff]  ;;  %v2137_v35 = vld [vmem:[#allocation19 + $0x68] sm:$0xff] }
 0x4a0   :  { %1126 = vmatpush.bf16.msra.mxu0 %v2130_v29  ;;  %1140 = vmatpush.bf16.msra.mxu1 %v2137_v35  ;;  %v2162_v29 = vld [vmem:[#allocation22 + $0x74] sm:$0xf]  ;;  %v1982_v35 = vld [vmem:[#allocation22 + $0x60] sm:$0xf] }
 0x4a1   :  { %832 = vadd.xlane.f32.xlu2 %v829_v36 }
 0x4a4   :  { %v827_v37 = vpop.f32.mrf.mxu1  ;;  %1127 = vmatpush.bf16.msra.mxu0 %v2129_v34  ;;  %v1992_v34 = vld [vmem:[#allocation22 + $0x78] sm:$0xf0] }
 0x4a5   :  { %v2136_v37 = vld [vmem:[#allocation19 + $0x60] sm:$0xff] }
 0x4a6   :  { %1141 = vmatpush.bf16.msra.mxu1 %v2136_v37 }
 0x4aa   :  { %1142 = vmatpush.bf16.msra.mxu1 %v2135_v41 }
 0x514   :  { %v833_v44 = vpop.xlane.xlu2 %832 }
 0x515   :  { %v834_v45 = vmul.f32 %v833_v44, %v2837_v30  ;;  %v2126_v44 = vld [vmem:[#allocation19 + $0x10] sm:$0xff] }
 0x517   :  { %v2864_v46 = vsub.f32 %v829_v36, %v834_v45  ;;  %v2128_v36 = vld [vmem:[#allocation19 + $0x20] sm:$0xff]  ;;  %v2134_v45 = vld [vmem:[#allocation19 + $0x50] sm:$0xff] }
 0x518   :  { %1128 = vmatpush.bf16.msra.mxu0 %v2128_v36  ;;  %1143 = vmatpush.bf16.msra.mxu1 %v2134_v45  ;;  %v2161_v36 = vld [vmem:[#allocation22 + $0x64] sm:$0xf0]  ;;  %v2159_v45 = vld [vmem:[#allocation22 + $0x54] sm:$0xf0] }
 0x519   :  { %v836_v33 = vmul.f32 %v2864_v46, %v2864_v46  ;;  %v1983_v41 = vor.u32 %v2161_v36, %v1982_v35  ;;  %v2176_v35 = vld [vmem:[#allocation23 + $0x60] sm:$0xff] }
 0x51a   :  { %v2168_v36 = vld [vmem:[#allocation23 + $0x20] sm:$0xff] }
 0x51b   :  { %837 = vadd.xlane.f32.xlu2 %v836_v33 }
 0x51c   :  { %1129 = vmatpush.bf16.msra.mxu0 %v2127_v40  ;;  %1144 = vmatpush.bf16.msra.mxu1 %v2133_v56  ;;  %v1984_v40 = vld [vmem:[#allocation22 + $0x68] sm:$0xf0]  ;;  %v1958_v56 = vld [vmem:[#allocation22 + $0x30] sm:$0xf] }
 0x520   :  { %1130 = vmatpush.bf16.msra.mxu0 %v2126_v44  ;;  %1145 = vmatpush.bf16.msra.mxu1 %v2132_v58  ;;  %v1974_v44 = vld [vmem:[#allocation22 + $0x50] sm:$0xf] }
 0x524   :  { %1131 = vmatpush.bf16.msra.mxu0 %v2125_v55 }
 0x528   :  { %1132 = vmatpush.bf16.msra.mxu0 %v2124_v57  ;;  %v2155_v57 = vld [vmem:[#allocation22 + $0x34] sm:$0xf0] }
 0x58e   :  { %v838_v27 = vpop.xlane.xlu2 %837 }
 0x58f   :  { %v839_v28 = vmul.f32 %v838_v27, %v2837_v30  ;;  %v1990_v27 = vld [vmem:[#allocation22 + $0x70] sm:$0xf] }
 0x591   :  { %v840_v32 = vadd.f32 1e-05, %v839_v28  ;;  %v2163_v28 = vld [vmem:[#allocation22 + $0x74] sm:$0xf0] }
 0x593   :  { %2221 = vrsqrt.f32 %v840_v32  ;;  %vm847_vm8 = vweird.f32 %v840_v32 }
 0x599   :  { %v2222_v38 = vpop.eup %2221 }
 0x59a   :  { %v842_v39 = vmul.f32 %v2222_v38, %v840_v32  ;;  %vm848_vm7 = vweird.f32 %v2222_v38  ;;  %v1991_v32 = vor.u32 %v2163_v28, %v1990_v27  ;;  %v1939_v27 = vor.u32 %v2148_v24, %v1936_v26  ;;  %v2171_v28 = vld [vmem:[#allocation23 + $0x38] sm:$0xff] }
 0x59b   :  { %vm849_vm9 = vmor %vm847_vm8, %vm848_vm7  ;;  %1529 = vmatpush.bf16.msrb.mxu1 %v2171_v28 }
 0x59c   :  { %v843_v42 = vmul.f32 %v2222_v38, %v842_v39  ;;  %v2160_v39 = vld [vmem:[#allocation22 + $0x64] sm:$0xf]  ;;  %1367 = vmatpush.bf16.msra.mxu3 %v1991_v32  ;;  %v2177_v32 = vld [vmem:[#allocation23 + $0x68] sm:$0xff] }
 0x59e   :  { %v844_v43 = vmul.f32 0.5, %v843_v42 }
 0x5a0   :  { %v845_v33 = vsub.f32 1.5, %v844_v43  ;;  %v1987_v43 = vor.u32 %v2160_v39, %v1984_v40  ;;  %1368 = vmatpush.bf16.msra.mxu3 %v1983_v41  ;;  %v2174_v39 = vld [vmem:[#allocation23 + $0x50] sm:$0xff] }
 0x5a1   :  { %v2213_v40 = vld [vmem:[%s2930_s23] ss:$0 sm:$0xff]  ;;  %s2965_s23 = sld [smem:[#allocation48_spill]] }
 0x5a2   :  { %v846_v47 = vmul.f32 %v2222_v38, %v845_v33  ;;  %v2158_v33 = vld [vmem:[#allocation22 + $0x54] sm:$0xf] }
 0x5a4   :  { %v850_v49 = vsel %vm849_vm9, %v2222_v38, %v846_v47  ;;  %v1995_v38 = vor.u32 %v2162_v29, %v1992_v34  ;;  %v1976_v47 = vld [vmem:[#allocation22 + $0x58] sm:$0xf0]  ;;  %v2178_v29 = vld [vmem:[#allocation23 + $0x70] sm:$0xff]  ;;  %v2169_v34 = vld [vmem:[#allocation23 + $0x28] sm:$0xff] }
 0x5a5   :  { %v851_v50 = vmul.f32 %v850_v49, %v2864_v46  ;;  %v877_v46 = vld [vmem:[%s2924_s17] sm:$0x3]  ;;  %v1979_v49 = vor.u32 %v2158_v33, %v1976_v47  ;;  %v2172_v47 = vld [vmem:[#allocation23 + $0x40] sm:$0xff] }
 0x5a6   :  { %v879_v59 = vperm.slane %v877_v46, 0  ;;  %v880_v60 = vperm.slane %v877_v46, 1  ;;  %1380 = vmatpush.bf16.msrb.mxu0 %v1995_v38  ;;  %v2154_v46 = vld [vmem:[#allocation22 + $0x34] sm:$0xf]  ;;  %v2167_v38 = vld [vmem:[#allocation23 + $0x18] sm:$0xff] }
 0x5a7   :  { %v855_v52 = vmul.f32 %v2208_v48, %v851_v50  ;;  %v1975_v48 = vor.u32 %v2159_v45, %v1974_v44  ;;  %v1966_v50 = vld [vmem:[#allocation22 + $0x40] sm:$0xf]  ;;  %v2173_v45 = vld [vmem:[#allocation23 + $0x48] sm:$0xff]  ;;  %v2166_v33 = vld [vmem:[#allocation23 + $0x10] sm:$0xff] }
 0x5a9   :  { %v859_v53 = vadd.f32 %v2209_v51, %v855_v52  ;;  %v2157_v51 = vld [vmem:[#allocation22 + $0x44] sm:$0xf0]  ;;  %v1968_v52 = vld [vmem:[#allocation22 + $0x48] sm:$0xf0]  ;;  %1369 = vmatpush.bf16.msra.mxu3 %v1975_v48 }
 0x5aa   :  { %1381 = vmatpush.bf16.msrb.mxu0 %v1987_v43  ;;  %v2165_v48 = vld [vmem:[#allocation23 + $0x8] sm:$0xff] }
 0x5ab   :  { %v876_v54 = vpack.c.bf16 %v859_v53, %v859_v53 }
 0x5ad   :  { %971 = vmatmul.bf16.vlgmr.msrb.gmra.mxu2 %v876_v54  ;;  %984 = vmatmul.bf16.vlgmr.msrb.gmra.mxu3 %v876_v54 }
 0x5ae   :  { %1382 = vmatpush.bf16.msrb.mxu0 %v1979_v49  ;;  %v2164_v49 = vld [vmem:[#allocation23] sm:$0xff] }
 0x630   :  { %v972_v61 = vpop.f32.mrf.mxu2  ;;  %v985_v62 = vpop.f32.mrf.mxu3 }
 0x631   :  { %v973_v63 = vadd.f32 %v972_v61, %v879_v59  ;;  %v986_v0 = vadd.f32 %v985_v62, %v880_v60  ;;  %v1960_v59 = vld [vmem:[#allocation22 + $0x38] sm:$0xf0]  ;;  %v1959_v61 = vor.u32 %v2155_v57, %v1958_v56 }
 0x632   :  { %v1963_v62 = vor.u32 %v2154_v46, %v1960_v59 }
 0x633   :  { %v989_v1 = vmax.f32 %v973_v63, 0.0  ;;  %v990_v2 = vmax.f32 %v986_v0, 0.0  ;;  %v1950_v63 = vld [vmem:[#allocation22 + $0x20] sm:$0xf]  ;;  %v2153_v0 = vld [vmem:[#allocation22 + $0x24] sm:$0xf0] }
 0x635   :  { %v1023_v3 = vpack.c.bf16 %v989_v1, %v989_v1  ;;  %v1024_v4 = vpack.c.bf16 %v990_v2, %v990_v2  ;;  %v2152_v2 = vld [vmem:[#allocation22 + $0x24] sm:$0xf] }
 0x637   :  { %1133 = vmatmul.bf16.vlgmr.msra.gmra.mxu0 %v1023_v3  ;;  %1146 = vmatmul.bf16.vlgmr.msra.gmra.mxu1 %v1024_v4  ;;  %v1952_v3 = vld [vmem:[#allocation22 + $0x28] sm:$0xf0] }
 0x638   :  { %v974_v5 = vpop.f32.mrf.mxu2  ;;  %v987_v6 = vpop.f32.mrf.mxu3 }
 0x639   :  { %v1951_v5 = vor.u32 %v2153_v0, %v1950_v63  ;;  %v1955_v6 = vor.u32 %v2152_v2, %v1952_v3 }
 0x6b4   :  { %v1134_v8 = vpop.f32.mrf.mxu0  ;;  %v1147_v9 = vpop.f32.mrf.mxu1 }
 0x6b5   :  { %v1135_v10 = vadd.f32 %v2210_v7, %v1134_v8  ;;  %v1942_v7 = vld [vmem:[#allocation22 + $0x10] sm:$0xf]  ;;  %v2151_v8 = vld [vmem:[#allocation22 + $0x14] sm:$0xf0] }
 0x6b7   :  { %v1148_v11 = vadd.f32 %v1147_v9, %v1135_v10  ;;  %v2150_v10 = vld [vmem:[#allocation22 + $0x14] sm:$0xf] }
 0x6b9   :  { %v1151_v12 = vadd.f32 %v1148_v11, %v859_v53  ;;  %v1967_v53 = vor.u32 %v2157_v51, %v1966_v50  ;;  %v1944_v11 = vld [vmem:[#allocation22 + $0x18] sm:$0xf0]  ;;  %v1281_v50 = vld [vmem:[%s2965_s23] sm:$0x3] }
 0x6ba   :  { %v1284_v51 = vperm.slane %v1281_v50, 1 }
 0x6bb   :  { %1154 = vadd.xlane.f32.xlu0 %v1151_v12  ;;  %1370 = vmatpush.bf16.msra.mxu3 %v1967_v53 }
 0x6bc   :  { %v1136_v13 = vpop.f32.mrf.mxu0  ;;  %v1149_v14 = vpop.f32.mrf.mxu1 }
 0x6bd   :  { %v1943_v14 = vor.u32 %v2151_v8, %v1942_v7 }
 0x6bf   :  { %1371 = vmatpush.bf16.msra.mxu3 %v1959_v61  ;;  %v2214_v61 = vld [vmem:[%s2966_s0] ss:$0 sm:$0xff] }
 0x6c3   :  { %1372 = vmatpush.bf16.msra.mxu3 %v1951_v5 }
 0x6c7   :  { %1373 = vmatpush.bf16.msra.mxu3 %v1943_v14 }
 0x6cb   :  { %1374 = vmatpush.bf16.msra.mxu3 %v1935_v25 }
 0x72e   :  { %v1155_v16 = vpop.xlane.xlu0 %1154 }
 0x72f   :  { %v1156_v17 = vmul.f32 %v1155_v16, %v2837_v30  ;;  %v2212_v16 = vld [vmem:[%s2928_s21] ss:$0 sm:$0xff] }
 0x731   :  { %v2883_v18 = vsub.f32 %v1151_v12, %v1156_v17  ;;  %v2211_v12 = vld [vmem:[%s2927_s20] ss:$0 sm:$0xff]  ;;  %v1947_v17 = vor.u32 %v2150_v10, %v1944_v11 }
 0x733   :  { %v1158_v19 = vmul.f32 %v2883_v18, %v2883_v18 }
 0x735   :  { %1159 = vadd.xlane.f32.xlu1 %v1158_v19 }
 0x7a8   :  { %v1160_v31 = vpop.xlane.xlu1 %1159 }
 0x7a9   :  { %v1161_v37 = vmul.f32 %v1160_v31, %v2837_v30  ;;  %v2156_v30 = vld [vmem:[#allocation22 + $0x44] sm:$0xf]  ;;  %v2170_v31 = vld [vmem:[#allocation23 + $0x30] sm:$0xff] }
 0x7aa   :  { %v1971_v55 = vor.u32 %v2156_v30, %v1968_v52  ;;  %1530 = vmatpush.bf16.msrb.mxu1 %v2170_v31 }
 0x7ab   :  { %v1162_v42 = vadd.f32 1e-05, %v1161_v37  ;;  %v2175_v37 = vld [vmem:[#allocation23 + $0x58] sm:$0xff] }
 0x7ac   :  { %1383 = vmatpush.bf16.msrb.mxu0 %v1971_v55 }
 0x7ad   :  { %2223 = vrsqrt.f32 %v1162_v42  ;;  %vm1169_vm11 = vweird.f32 %v1162_v42 }
 0x7ae   :  { %1531 = vmatpush.bf16.msrb.mxu1 %v2169_v34 }
 0x7b0   :  { %1384 = vmatpush.bf16.msrb.mxu0 %v1963_v62 }
 0x7b2   :  { %1532 = vmatpush.bf16.msrb.mxu1 %v2168_v36 }
 0x7b3   :  { %v2224_v54 = vpop.eup %2223 }
 0x7b4   :  { %v1164_v58 = vmul.f32 %v2224_v54, %v1162_v42  ;;  %vm1170_vm10 = vweird.f32 %v2224_v54  ;;  %1385 = vmatpush.bf16.msrb.mxu0 %v1955_v6 }
 0x7b5   :  { %vm1171_vm12 = vmor %vm1169_vm11, %vm1170_vm10 }
 0x7b6   :  { %v1165_v60 = vmul.f32 %v2224_v54, %v1164_v58  ;;  %1533 = vmatpush.bf16.msrb.mxu1 %v2167_v38 }
 0x7b8   :  { %v1166_v1 = vmul.f32 0.5, %v1165_v60  ;;  %1386 = vmatpush.bf16.msrb.mxu0 %v1947_v17 }
 0x7ba   :  { %v1167_v4 = vsub.f32 1.5, %v1166_v1  ;;  %1534 = vmatpush.bf16.msrb.mxu1 %v2166_v33 }
 0x7bc   :  { %v1168_v9 = vmul.f32 %v2224_v54, %v1167_v4  ;;  %1387 = vmatpush.bf16.msrb.mxu0 %v1939_v27 }
 0x7be   :  { %v1172_v13 = vsel %vm1171_vm12, %v2224_v54, %v1168_v9  ;;  %1535 = vmatpush.bf16.msrb.mxu1 %v2165_v48  ;;  %v1283_v54 = vperm.slane %v1281_v50, 0 }
 0x7bf   :  { %v1173_v15 = vmul.f32 %v1172_v13, %v2883_v18  ;;  %v2179_v18 = vld [vmem:[#allocation23 + $0x78] sm:$0xff] }
 0x7c0   :  { %1542 = vmatpush.bf16.msrb.mxu2 %v2179_v18 }
 0x7c1   :  { %v1177_v19 = vmul.f32 %v2211_v12, %v1173_v15 }
 0x7c2   :  { %1536 = vmatpush.bf16.msrb.mxu1 %v2164_v49 }
 0x7c3   :  { %v1181_v20 = vadd.f32 %v2212_v16, %v1177_v19 }
 0x7c4   :  { %1543 = vmatpush.bf16.msrb.mxu2 %v2178_v29 }
 0x7c5   :  { %v1198_v21 = vpack.c.bf16 %v1181_v20, %v1181_v20 }
 0x7c7   :  { %1259 = vmatmul.bf16.vlgmr.msra.gmra.mxu2 %v1198_v21 }
 0x7c8   :  { %1544 = vmatpush.bf16.msrb.mxu2 %v2177_v32 }
 0x7cc   :  { %1545 = vmatpush.bf16.msrb.mxu2 %v2176_v35 }
 0x7d0   :  { %1546 = vmatpush.bf16.msrb.mxu2 %v2175_v37 }
 0x7d4   :  { %1547 = vmatpush.bf16.msrb.mxu2 %v2174_v39 }
 0x7d8   :  { %1548 = vmatpush.bf16.msrb.mxu2 %v2173_v45 }
 0x7dc   :  { %1549 = vmatpush.bf16.msrb.mxu2 %v2172_v47 }
 0x84a   :  { %v1260_v41 = vpop.f32.mrf.mxu2 }
 0x84b   :  { %v1261_v42 = vadd.f32 %v2213_v40, %v1260_v41 }
 0x84d   :  { %v1280_v43 = vpack.c.bf16 %v1261_v42, %v1261_v42 }
 0x84f   :  { %1375 = vmatmul.bf16.vlgmr.msra.gmra.mxu3 %v1280_v43  ;;  %1388 = vmatmul.bf16.vlgmr.msrb.gmra.mxu0 %v1280_v43 }
 0x852   :  { %v1262_v44 = vpop.f32.mrf.mxu2 }
 0x8cc   :  { %v1389_v30 = vpop.f32.mrf.mxu0 }
 0x8cd   :  { %v1390_v52 = vadd.f32 %v1389_v30, %v1284_v51 }
 0x8cf   :  { %v1394_v53 = vmax.f32 %v1390_v52, 0.0 }
 0x8d1   :  { %v1428_v55 = vpack.c.bf16 %v1394_v53, %v1394_v53 }
 0x8d2   :  { %v1376_v56 = vpop.f32.mrf.mxu3 }
 0x8d3   :  { %v1377_v57 = vadd.f32 %v1376_v56, %v1283_v54  ;;  %1550 = vmatmul.bf16.vlgmr.msrb.gmra.mxu2 %v1428_v55 }
 0x8d4   :  { %v1391_v58 = vpop.f32.mrf.mxu0 }
 0x8d5   :  { %v1393_v46 = vmax.f32 %v1377_v57, 0.0 }
 0x8d7   :  { %v1427_v59 = vpack.c.bf16 %v1393_v46, %v1393_v46 }
 0x8d9   :  { %1537 = vmatmul.bf16.vlgmr.msrb.gmra.mxu1 %v1427_v59 }
 0x8da   :  { %v1378_v60 = vpop.f32.mrf.mxu3 }
 0x956   :  { %v1538_v62 = vpop.f32.mrf.mxu1  ;;  %v1551_v63 = vpop.f32.mrf.mxu2 }
 0x957   :  { %v1539_v0 = vadd.f32 %v2214_v61, %v1538_v62 }
 0x959   :  { %v1552_v1 = vadd.f32 %v1551_v63, %v1539_v0 }
 0x95b   :  { %1555 = vst [vmem:[#allocation25] sm:$0xff] %v1552_v1 }
 0x95c   :  { %1566 = dma.vmem_to_hbm [thread:$0]  %s1562_s8, 128, %s1564_s9, [#allocation4]  }
 0x95e   :  { %v1540_v2 = vpop.f32.mrf.mxu1  ;;  %v1553_v3 = vpop.f32.mrf.mxu2 }
 0x95f   :  { %2601 = dma.done.wait [#allocation4], 128  }
 0x960   :  { %2602 = vsyncadd [#allocation4], 4294967168 }
 0x961   :  { %1571 = vsyncpa [#allocation3], 1 }
 0x962   :  { %1572 = vsyncpa [#allocation6], 1 }
 0x963   :  { %1573 = vsyncpa [#allocation9], 1 }
 0x964   :  { %1574 = vsyncpa [#allocation12], 1 }
 0x965   :  { %1575 = vsyncpa [#allocation15], 1 }
 0x966   :  { %1576 = vsyncpa [#allocation18], 1 }
 0x967   :  { %1577 = vsyncpa [#allocation21], 1 }
 0x968   :  { %1578 = vsyncpa [#allocation24], 1 }
 0x969   :  { %1579 = vsyncpa [#allocation4], 1 }

</bundles_post_ra>
